<compile_context>
chip_gen: v6e
topology: v6e:2x2x1
jax: 0.10.0
libtpu: 0.0.40
codegen_flags: <defaults>
</compile_context>

<pallas_src>
import functools
from collections import defaultdict

import jax
import jax.numpy as jnp
from jax.experimental import pallas as pl
from jax.experimental.pallas import tpu as pltpu

INIT_RANGE = 0.04

# aw_nas genotype format: (op_type, from_node, to_node); classic DARTS_RNN cell.
GENOTYPE = [
    ("sigmoid", 0, 1),
    ("relu", 1, 2),
    ("relu", 1, 3),
    ("identity", 1, 4),
    ("tanh", 2, 5),
    ("sigmoid", 5, 6),
    ("tanh", 3, 7),
    ("relu", 5, 8),
]
CONCAT = list(range(1, 9))

_ACTS = {
    "sigmoid": jax.nn.sigmoid,
    "tanh": jnp.tanh,
    "relu": lambda v: jnp.maximum(v, 0.0),
    "identity": lambda v: v,
}


def _build_groups(genotype):
    """Group edges by source node, ordered so a group only runs after its
    source node is fully accumulated.  Returns [(source, [edge_ids...]), ...]."""
    by_src = defaultdict(list)
    for i, (_, frm, _) in enumerate(genotype):
        by_src[frm].append(i)
    remaining_in = defaultdict(int)
    for (_, _, to_) in genotype:
        remaining_in[to_] += 1
    produced = {0}
    pending = dict(by_src)
    groups = []
    while pending:
        ready = [s for s in pending if s in produced and remaining_in.get(s, 0) == 0]
        assert ready, "genotype DAG cannot be grouped by source"
        s = min(ready)
        edge_ids = pending.pop(s)
        groups.append((s, edge_ids))
        for i in edge_ids:
            to_ = genotype[i][2]
            remaining_in[to_] -= 1
            if remaining_in[to_] == 0:
                produced.add(to_)
    return groups


def _pick_batch_tile(batch):
    if batch <= 256:
        return batch
    for bm in (512, 256, 128, 64, 32, 16, 8):
        if batch % bm == 0:
            return bm
    return batch


def _cell_kernel(xh_ref, h_ref, wprev_ref, *gw_and_out,
                 num_hid, groups, genotype, concat):
    """One-timestep RNN genotype cell (one batch tile).

    xh_ref   : (bm, E+H)       cat(x, h), already in the matmul (param) dtype
    h_ref    : (bm, H)         previous hidden (f32, for the lerp)
    wprev_ref: (E+H, 2H)       fused w_prev^T
    gw_refs  : per source-group fused edge weights, (H, 2H * n_edges_in_group)
    out_ref  : (bm, H)
    """
    out_ref = gw_and_out[-1]
    gw_refs = gw_and_out[:-1]
    H = num_hid
    param_dtype = wprev_ref.dtype

    xh = xh_ref[...]
    h = h_ref[...].astype(jnp.float32)

    # init state: one fused matmul, split 2H output on the lane axis.
    ch0 = jnp.dot(xh, wprev_ref[...], preferred_element_type=jnp.float32)
    c0 = jax.nn.sigmoid(ch0[:, :H])
    h0 = jnp.tanh(ch0[:, H:2 * H])
    s0 = h + c0 * (h0 - h)

    # DAG bookkeeping (all static / trace-time).
    n_in = defaultdict(int)
    for (_, _, to_) in genotype:
        n_in[to_] += 1
    seen = defaultdict(int)
    concat_set = set(concat)

    states = {0: s0}
    acc = s0 if 0 in concat_set else jnp.zeros_like(s0)

    # One matmul per source-node group; edges of the group share the LHS.
    for (src, edge_ids), gw_ref in zip(groups, gw_refs):
        s_prev = states[src]
        ch = jnp.dot(s_prev.astype(param_dtype), gw_ref[...],
                     preferred_element_type=jnp.float32)
        for j, ei in enumerate(edge_ids):
            op_type, _, to_ = genotype[ei]
            c = jax.nn.sigmoid(ch[:, (2 * j) * H:(2 * j + 1) * H])
            hh = _ACTS[op_type](ch[:, (2 * j + 1) * H:(2 * j + 2) * H])
            out = s_prev + c * (hh - s_prev)
            states[to_] = states[to_] + out if to_ in states else out
            seen[to_] += 1
            # accumulate the concat-mean as soon as a node is finalized so it
            # does not have to stay live until the end.
            if seen[to_] == n_in[to_] and to_ in concat_set:
                acc = acc + states[to_]

    out_ref[...] = (acc * (1.0 / float(len(concat)))).astype(out_ref.dtype)


def prepare_weights(w_prev, ws, genotype=GENOTYPE, param_dtype=jnp.float32):
    """One-time weight layout (do this OUTSIDE any per-timestep loop).

    w_prev: (2H, E+H) torch Linear weight.
    ws    : (n_edges, 2H, H) stacked per-edge torch Linear weights.
    Returns (wprev_fused (E+H,2H), tuple of per-group fused weights, groups).
    """
    groups = _build_groups(genotype)
    wprev_f = jnp.transpose(w_prev).astype(param_dtype)          # (E+H, 2H)
    ws_t = jnp.transpose(ws, (0, 2, 1))                          # (n_edges, H, 2H)
    group_ws = tuple(
        jnp.concatenate([ws_t[i] for i in edge_ids], axis=1).astype(param_dtype)
        for _, edge_ids in groups)
    return wprev_f, group_ws, groups


def rnn_genotype_cell(x, h, wprev_f, group_ws, groups, *, num_emb, num_hid,
                      genotype=GENOTYPE, concat=CONCAT):
    """x: (B, E); h: (B, H); weights pre-laid-out by prepare_weights()."""
    assert x.shape[1] == num_emb and h.shape[1] == num_hid
    batch = x.shape[0]
    param_dtype = wprev_f.dtype
    itemsize_p = jnp.dtype(param_dtype).itemsize

    # Single concat in the wrapper; matmul LHS carried in the param dtype.
    xh = jnp.concatenate([x, h], axis=-1).astype(param_dtype)    # (B, E+H)

    bm = _pick_batch_tile(batch)
    grid = (batch // bm,)

    kernel = functools.partial(
        _cell_kernel, num_hid=num_hid, groups=groups,
        genotype=genotype, concat=concat)

    in_specs = [
        pl.BlockSpec((bm, num_emb + num_hid), lambda i: (i, 0)),
        pl.BlockSpec((bm, num_hid), lambda i: (i, 0)),
        pl.BlockSpec(wprev_f.shape, lambda i: (0, 0)),
    ] + [pl.BlockSpec(gw.shape, lambda i: (0, 0)) for gw in group_ws]

    # VMEM budget: weights (+double-buffer) + activation tiles (+double-buffer).
    weight_bytes = wprev_f.size * itemsize_p + sum(g.size * itemsize_p for g in group_ws)
    act_block_bytes = (bm * (num_emb + num_hid) * itemsize_p
                       + 2 * bm * num_hid * 4)
    vmem_need = 2 * weight_bytes + 2 * act_block_bytes + (2 << 20)
    vmem_limit = int(min(64 << 20, max(16 << 20, vmem_need)))

    n_edges = len(genotype)
    cost = pl.CostEstimate(
        flops=2 * batch * (num_emb + num_hid) * 2 * num_hid
              + 2 * n_edges * batch * num_hid * 2 * num_hid,
        transcendentals=batch * num_hid * (2 + 2 * n_edges),
        bytes_accessed=int(xh.size * itemsize_p + h.size * 4 + weight_bytes
                           + batch * num_hid * 4),
    )

    return pl.pallas_call(
        kernel,
        out_shape=jax.ShapeDtypeStruct((batch, num_hid), jnp.float32),
        grid=grid,
        in_specs=in_specs,
        out_specs=pl.BlockSpec((bm, num_hid), lambda i: (i, 0)),
        compiler_params=pltpu.CompilerParams(
            dimension_semantics=("parallel",),
            vmem_limit_bytes=vmem_limit),
        cost_estimate=cost,
    )(xh, h, wprev_f, *group_ws)


def rnn_genotype_cell_from_torch_layout(x, h, w_prev, ws, *, num_emb, num_hid,
                                        param_dtype=jnp.float32):
    """Convenience wrapper: weight prep + cell call (prep once if looping)."""
    wprev_f, group_ws, groups = prepare_weights(w_prev, ws, GENOTYPE, param_dtype)
    return rnn_genotype_cell(x, h, wprev_f, group_ws, groups,
                             num_emb=num_emb, num_hid=num_hid)


def _reference(x, h, w_prev, ws, num_hid):
    """Pure-JAX replica of the PyTorch forward (eval mode, no batchnorm)."""
    xh = jnp.concatenate([x, h], axis=-1)
    ch = xh @ w_prev.T
    c0 = jax.nn.sigmoid(ch[:, :num_hid])
    h0 = jnp.tanh(ch[:, num_hid:])
    s0 = h + c0 * (h0 - h)
    states = {0: s0}
    for i, (op_type, from_, to_) in enumerate(GENOTYPE):
        s_prev = states[from_]
        ch = s_prev @ ws[i].T
        c = jax.nn.sigmoid(ch[:, :num_hid])
        hh = _ACTS[op_type](ch[:, num_hid:])
        out = s_prev + c * (hh - s_prev)
        states[to_] = states[to_] + out if to_ in states else out
    return jnp.mean(jnp.stack([states[n] for n in CONCAT]), axis=0)


if __name__ == "__main__":
    # Small but lane/sublane-dense demo shapes (batch multiple of 8, H,E = 128).
    batch, num_emb, num_hid = 8, 128, 128
    n_edges = len(GENOTYPE)

    key = jax.random.PRNGKey(0)
    k_x, k_h, k_wp, k_ws = jax.random.split(key, 4)

    x = jax.random.normal(k_x, (batch, num_emb), dtype=jnp.float32)
    h = jax.random.normal(k_h, (batch, num_hid), dtype=jnp.float32)

    # uniform(-INIT_RANGE, INIT_RANGE), matching .uniform_(-INIT_RANGE, INIT_RANGE).
    w_prev = jax.random.uniform(
        k_wp, (2 * num_hid, num_emb + num_hid),
        minval=-INIT_RANGE, maxval=INIT_RANGE, dtype=jnp.float32)
    ws = jax.random.uniform(
        k_ws, (n_edges, 2 * num_hid, num_hid),
        minval=-INIT_RANGE, maxval=INIT_RANGE, dtype=jnp.float32)

    ref = _reference(x, h, w_prev, ws, num_hid)

    # f32 parameter path (tight tolerance).
    out_f32 = rnn_genotype_cell_from_torch_layout(
        x, h, w_prev, ws, num_emb=num_emb, num_hid=num_hid,
        param_dtype=jnp.float32)
    out_f32 = jax.block_until_ready(out_f32)
    assert out_f32.shape == (batch, num_hid)
    assert jnp.allclose(out_f32, ref, atol=1e-5, rtol=1e-5), "f32 mismatch vs reference"

    # bf16 parameter path (MXU-native on v6e/v7x; looser tolerance).
    out_bf16 = rnn_genotype_cell_from_torch_layout(
        x, h, w_prev, ws, num_emb=num_emb, num_hid=num_hid,
        param_dtype=jnp.bfloat16)
    out_bf16 = jax.block_until_ready(out_bf16)
    assert out_bf16.shape == (batch, num_hid)
    assert jnp.allclose(out_bf16, ref, atol=5e-2, rtol=5e-2), "bf16 mismatch vs reference"

    print("KERNEL_OK")
</pallas_src>

<mosaic_0001>
module attributes {stable_mosaic.version = 11 : i64} {
  func.func @_cell_kernel(%arg0: i32, %arg1: memref<8x256xf32, #tpu.memory_space<vmem>>, %arg2: memref<8x128xf32, #tpu.memory_space<vmem>>, %arg3: memref<256x256xf32, #tpu.memory_space<vmem>>, %arg4: memref<128x256xf32, #tpu.memory_space<vmem>>, %arg5: memref<128x768xf32, #tpu.memory_space<vmem>>, %arg6: memref<128x256xf32, #tpu.memory_space<vmem>>, %arg7: memref<128x256xf32, #tpu.memory_space<vmem>>, %arg8: memref<128x512xf32, #tpu.memory_space<vmem>>, %arg9: memref<8x128xf32, #tpu.memory_space<vmem>>) attributes {dimension_semantics = [#tpu.dimension_semantics<parallel>], iteration_bounds = array<i64: 1>, scalar_prefetch = 0 : i64, scratch_operands = 0 : i64, tpu.core_type = #tpu.core_type<tc>, window_params = [{transform_indices = @transform_0, window_bounds = array<i64: 8, 256>}, {transform_indices = @transform_1, window_bounds = array<i64: 8, 128>}, {pipeline_mode = #tpu.pipeline_mode<synchronous>, transform_indices = @transform_2, window_bounds = array<i64: 256, 256>}, {pipeline_mode = #tpu.pipeline_mode<synchronous>, transform_indices = @transform_3, window_bounds = array<i64: 128, 256>}, {pipeline_mode = #tpu.pipeline_mode<synchronous>, transform_indices = @transform_4, window_bounds = array<i64: 128, 768>}, {pipeline_mode = #tpu.pipeline_mode<synchronous>, transform_indices = @transform_5, window_bounds = array<i64: 128, 256>}, {pipeline_mode = #tpu.pipeline_mode<synchronous>, transform_indices = @transform_6, window_bounds = array<i64: 128, 256>}, {pipeline_mode = #tpu.pipeline_mode<synchronous>, transform_indices = @transform_7, window_bounds = array<i64: 128, 512>}, {transform_indices = @transform_8, window_bounds = array<i64: 8, 128>}]} {
    %c0 = arith.constant 0 : index
    %c0_0 = arith.constant 0 : index
    %0 = vector.load %arg1[%c0, %c0_0] : memref<8x256xf32, #tpu.memory_space<vmem>>, vector<8x256xf32>
    %c0_1 = arith.constant 0 : index
    %c0_2 = arith.constant 0 : index
    %1 = vector.load %arg2[%c0_1, %c0_2] : memref<8x128xf32, #tpu.memory_space<vmem>>, vector<8x128xf32>
    %c0_3 = arith.constant 0 : index
    %c0_4 = arith.constant 0 : index
    %2 = vector.load %arg3[%c0_3, %c0_4] : memref<256x256xf32, #tpu.memory_space<vmem>>, vector<256x256xf32>
    %cst = arith.constant dense<0.000000e+00> : vector<8x256xf32>
    %3 = tpu.matmul %0, %2, %cst {dimension_numbers = #tpu.dot_dimension_numbers<[1], [0], [0], [1], [0, 0, 1, 1], [], []>} : vector<8x256xf32>, vector<256x256xf32>, vector<8x256xf32> -> vector<8x256xf32>
    %4 = vector.extract_strided_slice %3 {offsets = [0, 0], sizes = [8, 128], strides = [1, 1]} : vector<8x256xf32> to vector<8x128xf32>
    %5 = arith.negf %4 : vector<8x128xf32>
    %6 = math.exp %5 : vector<8x128xf32>
    %cst_5 = arith.constant 1.000000e+00 : f32
    %7 = vector.broadcast %cst_5 : f32 to vector<8x128xf32>
    %8 = arith.addf %7, %6 : vector<8x128xf32>
    %9 = arith.divf %7, %8 : vector<8x128xf32>
    %10 = vector.extract_strided_slice %3 {offsets = [0, 128], sizes = [8, 128], strides = [1, 1]} : vector<8x256xf32> to vector<8x128xf32>
    %11 = math.tanh %10 : vector<8x128xf32>
    %12 = arith.subf %11, %1 : vector<8x128xf32>
    %13 = arith.mulf %9, %12 : vector<8x128xf32>
    %14 = arith.addf %1, %13 : vector<8x128xf32>
    %cst_6 = arith.constant 0.000000e+00 : f32
    %15 = vector.broadcast %cst_6 : f32 to vector<8x128xf32>
    %c0_7 = arith.constant 0 : index
    %c0_8 = arith.constant 0 : index
    %16 = vector.load %arg4[%c0_7, %c0_8] : memref<128x256xf32, #tpu.memory_space<vmem>>, vector<128x256xf32>
    %cst_9 = arith.constant dense<0.000000e+00> : vector<8x256xf32>
    %17 = tpu.matmul %14, %16, %cst_9 {dimension_numbers = #tpu.dot_dimension_numbers<[1], [0], [0], [1], [0, 0, 1, 1], [], []>} : vector<8x128xf32>, vector<128x256xf32>, vector<8x256xf32> -> vector<8x256xf32>
    %18 = vector.extract_strided_slice %17 {offsets = [0, 0], sizes = [8, 128], strides = [1, 1]} : vector<8x256xf32> to vector<8x128xf32>
    %19 = arith.negf %18 : vector<8x128xf32>
    %20 = math.exp %19 : vector<8x128xf32>
    %cst_10 = arith.constant 1.000000e+00 : f32
    %21 = vector.broadcast %cst_10 : f32 to vector<8x128xf32>
    %22 = arith.addf %21, %20 : vector<8x128xf32>
    %23 = arith.divf %21, %22 : vector<8x128xf32>
    %24 = vector.extract_strided_slice %17 {offsets = [0, 128], sizes = [8, 128], strides = [1, 1]} : vector<8x256xf32> to vector<8x128xf32>
    %25 = arith.negf %24 : vector<8x128xf32>
    %26 = math.exp %25 : vector<8x128xf32>
    %cst_11 = arith.constant 1.000000e+00 : f32
    %27 = vector.broadcast %cst_11 : f32 to vector<8x128xf32>
    %28 = arith.addf %27, %26 : vector<8x128xf32>
    %29 = arith.divf %27, %28 : vector<8x128xf32>
    %30 = arith.subf %29, %14 : vector<8x128xf32>
    %31 = arith.mulf %23, %30 : vector<8x128xf32>
    %32 = arith.addf %14, %31 : vector<8x128xf32>
    %33 = arith.addf %15, %32 : vector<8x128xf32>
    %c0_12 = arith.constant 0 : index
    %c0_13 = arith.constant 0 : index
    %34 = vector.load %arg5[%c0_12, %c0_13] : memref<128x768xf32, #tpu.memory_space<vmem>>, vector<128x768xf32>
    %cst_14 = arith.constant dense<0.000000e+00> : vector<8x768xf32>
    %35 = tpu.matmul %32, %34, %cst_14 {dimension_numbers = #tpu.dot_dimension_numbers<[1], [0], [0], [1], [0, 0, 1, 1], [], []>} : vector<8x128xf32>, vector<128x768xf32>, vector<8x768xf32> -> vector<8x768xf32>
    %36 = vector.extract_strided_slice %35 {offsets = [0, 0], sizes = [8, 128], strides = [1, 1]} : vector<8x768xf32> to vector<8x128xf32>
    %37 = arith.negf %36 : vector<8x128xf32>
    %38 = math.exp %37 : vector<8x128xf32>
    %cst_15 = arith.constant 1.000000e+00 : f32
    %39 = vector.broadcast %cst_15 : f32 to vector<8x128xf32>
    %40 = arith.addf %39, %38 : vector<8x128xf32>
    %41 = arith.divf %39, %40 : vector<8x128xf32>
    %42 = vector.extract_strided_slice %35 {offsets = [0, 128], sizes = [8, 128], strides = [1, 1]} : vector<8x768xf32> to vector<8x128xf32>
    %cst_16 = arith.constant 0.000000e+00 : f32
    %43 = vector.broadcast %cst_16 : f32 to vector<8x128xf32>
    %44 = arith.maximumf %42, %43 : vector<8x128xf32>
    %45 = arith.subf %44, %32 : vector<8x128xf32>
    %46 = arith.mulf %41, %45 : vector<8x128xf32>
    %47 = arith.addf %32, %46 : vector<8x128xf32>
    %48 = arith.addf %33, %47 : vector<8x128xf32>
    %49 = vector.extract_strided_slice %35 {offsets = [0, 256], sizes = [8, 128], strides = [1, 1]} : vector<8x768xf32> to vector<8x128xf32>
    %50 = arith.negf %49 : vector<8x128xf32>
    %51 = math.exp %50 : vector<8x128xf32>
    %cst_17 = arith.constant 1.000000e+00 : f32
    %52 = vector.broadcast %cst_17 : f32 to vector<8x128xf32>
    %53 = arith.addf %52, %51 : vector<8x128xf32>
    %54 = arith.divf %52, %53 : vector<8x128xf32>
    %55 = vector.extract_strided_slice %35 {offsets = [0, 384], sizes = [8, 128], strides = [1, 1]} : vector<8x768xf32> to vector<8x128xf32>
    %cst_18 = arith.constant 0.000000e+00 : f32
    %56 = vector.broadcast %cst_18 : f32 to vector<8x128xf32>
    %57 = arith.maximumf %55, %56 : vector<8x128xf32>
    %58 = arith.subf %57, %32 : vector<8x128xf32>
    %59 = arith.mulf %54, %58 : vector<8x128xf32>
    %60 = arith.addf %32, %59 : vector<8x128xf32>
    %61 = arith.addf %48, %60 : vector<8x128xf32>
    %62 = vector.extract_strided_slice %35 {offsets = [0, 512], sizes = [8, 128], strides = [1, 1]} : vector<8x768xf32> to vector<8x128xf32>
    %63 = arith.negf %62 : vector<8x128xf32>
    %64 = math.exp %63 : vector<8x128xf32>
    %cst_19 = arith.constant 1.000000e+00 : f32
    %65 = vector.broadcast %cst_19 : f32 to vector<8x128xf32>
    %66 = arith.addf %65, %64 : vector<8x128xf32>
    %67 = arith.divf %65, %66 : vector<8x128xf32>
    %68 = vector.extract_strided_slice %35 {offsets = [0, 640], sizes = [8, 128], strides = [1, 1]} : vector<8x768xf32> to vector<8x128xf32>
    %69 = arith.subf %68, %32 : vector<8x128xf32>
    %70 = arith.mulf %67, %69 : vector<8x128xf32>
    %71 = arith.addf %32, %70 : vector<8x128xf32>
    %72 = arith.addf %61, %71 : vector<8x128xf32>
    %c0_20 = arith.constant 0 : index
    %c0_21 = arith.constant 0 : index
    %73 = vector.load %arg6[%c0_20, %c0_21] : memref<128x256xf32, #tpu.memory_space<vmem>>, vector<128x256xf32>
    %cst_22 = arith.constant dense<0.000000e+00> : vector<8x256xf32>
    %74 = tpu.matmul %47, %73, %cst_22 {dimension_numbers = #tpu.dot_dimension_numbers<[1], [0], [0], [1], [0, 0, 1, 1], [], []>} : vector<8x128xf32>, vector<128x256xf32>, vector<8x256xf32> -> vector<8x256xf32>
    %75 = vector.extract_strided_slice %74 {offsets = [0, 0], sizes = [8, 128], strides = [1, 1]} : vector<8x256xf32> to vector<8x128xf32>
    %76 = arith.negf %75 : vector<8x128xf32>
    %77 = math.exp %76 : vector<8x128xf32>
    %cst_23 = arith.constant 1.000000e+00 : f32
    %78 = vector.broadcast %cst_23 : f32 to vector<8x128xf32>
    %79 = arith.addf %78, %77 : vector<8x128xf32>
    %80 = arith.divf %78, %79 : vector<8x128xf32>
    %81 = vector.extract_strided_slice %74 {offsets = [0, 128], sizes = [8, 128], strides = [1, 1]} : vector<8x256xf32> to vector<8x128xf32>
    %82 = math.tanh %81 : vector<8x128xf32>
    %83 = arith.subf %82, %47 : vector<8x128xf32>
    %84 = arith.mulf %80, %83 : vector<8x128xf32>
    %85 = arith.addf %47, %84 : vector<8x128xf32>
    %86 = arith.addf %72, %85 : vector<8x128xf32>
    %c0_24 = arith.constant 0 : index
    %c0_25 = arith.constant 0 : index
    %87 = vector.load %arg7[%c0_24, %c0_25] : memref<128x256xf32, #tpu.memory_space<vmem>>, vector<128x256xf32>
    %cst_26 = arith.constant dense<0.000000e+00> : vector<8x256xf32>
    %88 = tpu.matmul %60, %87, %cst_26 {dimension_numbers = #tpu.dot_dimension_numbers<[1], [0], [0], [1], [0, 0, 1, 1], [], []>} : vector<8x128xf32>, vector<128x256xf32>, vector<8x256xf32> -> vector<8x256xf32>
    %89 = vector.extract_strided_slice %88 {offsets = [0, 0], sizes = [8, 128], strides = [1, 1]} : vector<8x256xf32> to vector<8x128xf32>
    %90 = arith.negf %89 : vector<8x128xf32>
    %91 = math.exp %90 : vector<8x128xf32>
    %cst_27 = arith.constant 1.000000e+00 : f32
    %92 = vector.broadcast %cst_27 : f32 to vector<8x128xf32>
    %93 = arith.addf %92, %91 : vector<8x128xf32>
    %94 = arith.divf %92, %93 : vector<8x128xf32>
    %95 = vector.extract_strided_slice %88 {offsets = [0, 128], sizes = [8, 128], strides = [1, 1]} : vector<8x256xf32> to vector<8x128xf32>
    %96 = math.tanh %95 : vector<8x128xf32>
    %97 = arith.subf %96, %60 : vector<8x128xf32>
    %98 = arith.mulf %94, %97 : vector<8x128xf32>
    %99 = arith.addf %60, %98 : vector<8x128xf32>
    %100 = arith.addf %86, %99 : vector<8x128xf32>
    %c0_28 = arith.constant 0 : index
    %c0_29 = arith.constant 0 : index
    %101 = vector.load %arg8[%c0_28, %c0_29] : memref<128x512xf32, #tpu.memory_space<vmem>>, vector<128x512xf32>
    %cst_30 = arith.constant dense<0.000000e+00> : vector<8x512xf32>
    %102 = tpu.matmul %85, %101, %cst_30 {dimension_numbers = #tpu.dot_dimension_numbers<[1], [0], [0], [1], [0, 0, 1, 1], [], []>} : vector<8x128xf32>, vector<128x512xf32>, vector<8x512xf32> -> vector<8x512xf32>
    %103 = vector.extract_strided_slice %102 {offsets = [0, 0], sizes = [8, 128], strides = [1, 1]} : vector<8x512xf32> to vector<8x128xf32>
    %104 = arith.negf %103 : vector<8x128xf32>
    %105 = math.exp %104 : vector<8x128xf32>
    %cst_31 = arith.constant 1.000000e+00 : f32
    %106 = vector.broadcast %cst_31 : f32 to vector<8x128xf32>
    %107 = arith.addf %106, %105 : vector<8x128xf32>
    %108 = arith.divf %106, %107 : vector<8x128xf32>
    %109 = vector.extract_strided_slice %102 {offsets = [0, 128], sizes = [8, 128], strides = [1, 1]} : vector<8x512xf32> to vector<8x128xf32>
    %110 = arith.negf %109 : vector<8x128xf32>
    %111 = math.exp %110 : vector<8x128xf32>
    %cst_32 = arith.constant 1.000000e+00 : f32
    %112 = vector.broadcast %cst_32 : f32 to vector<8x128xf32>
    %113 = arith.addf %112, %111 : vector<8x128xf32>
    %114 = arith.divf %112, %113 : vector<8x128xf32>
    %115 = arith.subf %114, %85 : vector<8x128xf32>
    %116 = arith.mulf %108, %115 : vector<8x128xf32>
    %117 = arith.addf %85, %116 : vector<8x128xf32>
    %118 = arith.addf %100, %117 : vector<8x128xf32>
    %119 = vector.extract_strided_slice %102 {offsets = [0, 256], sizes = [8, 128], strides = [1, 1]} : vector<8x512xf32> to vector<8x128xf32>
    %120 = arith.negf %119 : vector<8x128xf32>
    %121 = math.exp %120 : vector<8x128xf32>
    %cst_33 = arith.constant 1.000000e+00 : f32
    %122 = vector.broadcast %cst_33 : f32 to vector<8x128xf32>
    %123 = arith.addf %122, %121 : vector<8x128xf32>
    %124 = arith.divf %122, %123 : vector<8x128xf32>
    %125 = vector.extract_strided_slice %102 {offsets = [0, 384], sizes = [8, 128], strides = [1, 1]} : vector<8x512xf32> to vector<8x128xf32>
    %cst_34 = arith.constant 0.000000e+00 : f32
    %126 = vector.broadcast %cst_34 : f32 to vector<8x128xf32>
    %127 = arith.maximumf %125, %126 : vector<8x128xf32>
    %128 = arith.subf %127, %85 : vector<8x128xf32>
    %129 = arith.mulf %124, %128 : vector<8x128xf32>
    %130 = arith.addf %85, %129 : vector<8x128xf32>
    %131 = arith.addf %118, %130 : vector<8x128xf32>
    %cst_35 = arith.constant 1.250000e-01 : f32
    %132 = vector.broadcast %cst_35 : f32 to vector<8x128xf32>
    %133 = arith.mulf %131, %132 : vector<8x128xf32>
    %c0_36 = arith.constant 0 : index
    %c0_37 = arith.constant 0 : index
    %134 = vector.load %arg9[%c0_36, %c0_37] : memref<8x128xf32, #tpu.memory_space<vmem>>, vector<8x128xf32>
    tpu.vector_store %arg9[%c0_36, %c0_37], %133 {strides = array<i32>} : memref<8x128xf32, #tpu.memory_space<vmem>>, vector<8x128xf32>,
    return
  }
  func.func @transform_0(%arg0: i32) -> (i32, i32) {
    %c0_i32 = arith.constant 0 : i32
    %c0_i32_0 = arith.constant 0 : i32
    return %arg0, %c0_i32 : i32, i32
  }
  func.func @transform_1(%arg0: i32) -> (i32, i32) {
    %c0_i32 = arith.constant 0 : i32
    %c0_i32_0 = arith.constant 0 : i32
    return %arg0, %c0_i32 : i32, i32
  }
  func.func @transform_2(%arg0: i32) -> (i32, i32) {
    %c0_i32 = arith.constant 0 : i32
    %c0_i32_0 = arith.constant 0 : i32
    %c0_i32_1 = arith.constant 0 : i32
    return %c0_i32, %c0_i32_0 : i32, i32
  }
  func.func @transform_3(%arg0: i32) -> (i32, i32) {
    %c0_i32 = arith.constant 0 : i32
    %c0_i32_0 = arith.constant 0 : i32
    %c0_i32_1 = arith.constant 0 : i32
    return %c0_i32, %c0_i32_0 : i32, i32
  }
  func.func @transform_4(%arg0: i32) -> (i32, i32) {
    %c0_i32 = arith.constant 0 : i32
    %c0_i32_0 = arith.constant 0 : i32
    %c0_i32_1 = arith.constant 0 : i32
    return %c0_i32, %c0_i32_0 : i32, i32
  }
  func.func @transform_5(%arg0: i32) -> (i32, i32) {
    %c0_i32 = arith.constant 0 : i32
    %c0_i32_0 = arith.constant 0 : i32
    %c0_i32_1 = arith.constant 0 : i32
    return %c0_i32, %c0_i32_0 : i32, i32
  }
  func.func @transform_6(%arg0: i32) -> (i32, i32) {
    %c0_i32 = arith.constant 0 : i32
    %c0_i32_0 = arith.constant 0 : i32
    %c0_i32_1 = arith.constant 0 : i32
    return %c0_i32, %c0_i32_0 : i32, i32
  }
  func.func @transform_7(%arg0: i32) -> (i32, i32) {
    %c0_i32 = arith.constant 0 : i32
    %c0_i32_0 = arith.constant 0 : i32
    %c0_i32_1 = arith.constant 0 : i32
    return %c0_i32, %c0_i32_0 : i32, i32
  }
  func.func @transform_8(%arg0: i32) -> (i32, i32) {
    %c0_i32 = arith.constant 0 : i32
    %c0_i32_0 = arith.constant 0 : i32
    return %arg0, %c0_i32 : i32, i32
  }
}

</mosaic_0001>

<bundles_post_ra>
// kernel: tpu_custom_call.1
= control target key start
LH: loop header
LB: loop body
LE: loop exit
PB: predicated region body
PF: predicated region fallthrough
CT: control target
= control target key end

     0   :  { %13 = vsyncpa [#allocation3], 0  ;;  %s1631_s0 = inlined_call_operand.hbm [shape: f32[8,256], index: 0, kind: input, shape index: {}]   ;;  %s1632_s1 = inlined_call_operand.hbm [shape: f32[8,128], index: 1, kind: input, shape index: {}]   ;;  %s1633_s2 = inlined_call_operand.hbm [shape: f32[256,256], index: 2, kind: input, shape index: {}]   ;;  %s1634_s3 = inlined_call_operand.hbm [shape: f32[128,256], index: 3, kind: input, shape index: {}]   ;;  %s1635_s4 = inlined_call_operand.hbm [shape: f32[128,768], index: 4, kind: input, shape index: {}]   ;;  %s1636_s5 = inlined_call_operand.hbm [shape: f32[128,256], index: 5, kind: input, shape index: {}]   ;;  %s1637_s6 = inlined_call_operand.hbm [shape: f32[128,256], index: 6, kind: input, shape index: {}]   ;;  %s1638_s7 = inlined_call_operand.hbm [shape: f32[128,512], index: 7, kind: input, shape index: {}]   ;;  %s1639_s8 = inlined_call_operand.hbm [shape: f32[8,128], index: 8, kind: output, shape index: {}]  }
   0x1   :  { %14 = vsyncpa [#allocation6], 0 }
   0x2   :  { %15 = vsyncpa [#allocation9], 0 }
   0x3   :  { %16 = vsyncpa [#allocation12], 0 }
   0x4   :  { %17 = vsyncpa [#allocation15], 0 }
   0x5   :  { %18 = vsyncpa [#allocation4], 0  ;;  %s1494_s27 = smov [#allocation5]  }
   0x6   :  { %s35_s28 = sshll.u32 %s1494_s27, 4  ;;  %s36_s28 = int_to_ptr.vmem [resolvable:$true] %s35_s28 }
   0x7   :  { %s1310_s29 = scalar_lea.vmem %s36_s28, 128  ;;  %p1315_p1 = scmp.lt.s32.totalorder %s36_s28, %s36_s28 }
   0x8   :  { %p1311_p0 = scmp.ne.s32.totalorder %s36_s28, %s1310_s29  ;;  %p1316_p2 = scmp.lt.s32.totalorder %s1310_s29, %s1310_s29 }
   0xa   :  { %p1317_p3 = por %p1316_p2, %p1315_p1 }
   0xc   :  { %p1318_p4 = pnand %p1317_p3, %p1311_p0 }
   0xe   :  { %1321 = shalt.err (!%p1318_p4)
}
   0xf   :  { %38 = dma.hbm_to_vmem [thread:$0]  %s1632_s1, 128, %s36_s28, [#allocation6]  }
  0x10   :  { %s1495_s10 = smov [#allocation8]   ;;  %s1496_s12 = smov [#allocation11]  }
  0x11   :  { %s56_s11 = sshll.u32 %s1495_s10, 4  ;;  %s80_s13 = sshll.u32 %s1496_s12, 4  ;;  %s57_s11 = int_to_ptr.vmem [resolvable:$true] %s56_s11  ;;  %s81_s13 = int_to_ptr.vmem [resolvable:$true] %s80_s13 }
  0x12   :  { %s1330_s14 = scalar_lea.vmem %s57_s11, 4096  ;;  %p1335_p6 = scmp.lt.s32.totalorder %s57_s11, %s57_s11 }
  0x13   :  { %p1331_p5 = scmp.ne.s32.totalorder %s57_s11, %s1330_s14  ;;  %p1336_p7 = scmp.lt.s32.totalorder %s1330_s14, %s1330_s14 }
  0x15   :  { %p1337_p8 = por %p1336_p7, %p1335_p6 }
  0x17   :  { %p1338_p9 = pnand %p1337_p8, %p1331_p5 }
  0x19   :  { %1341 = shalt.err (!%p1338_p9)
}
  0x1a   :  { %s1497_s15 = smov 256   ;;  %s1498_s16 = smov 16  }
  0x1b   :  { %62 = dma.hbm_to_vmem [thread:$0]  %s1634_s3, 4096, %s57_s11, [#allocation9], %s1497_s15, %s1497_s15, %s1498_s16  }
  0x1c   :  { %s1350_s1 = scalar_lea.vmem %s81_s13, 4096  ;;  %p1355_p11 = scmp.lt.s32.totalorder %s81_s13, %s81_s13 }
  0x1d   :  { %p1351_p10 = scmp.ne.s32.totalorder %s81_s13, %s1350_s1  ;;  %p1356_p12 = scmp.lt.s32.totalorder %s1350_s1, %s1350_s1 }
  0x1f   :  { %p1357_p13 = por %p1356_p12, %p1355_p11 }
  0x21   :  { %p1358_p0 = pnand %p1357_p13, %p1351_p10 }
  0x23   :  { %1361 = shalt.err (!%p1358_p0)
}
  0x24   :  { %86 = dma.hbm_to_vmem [thread:$0]  %s1636_s5, 4096, %s81_s13, [#allocation12], %s1497_s15, %s1497_s15, %s1498_s16  }
  0x25   :  { %s1499_s21 = smov [#allocation2]   ;;  %s1500_s23 = smov [#allocation7]  }
  0x26   :  { %s25_s22 = sshll.u32 %s1499_s21, 4  ;;  %s44_s3 = sshll.u32 %s1500_s23, 4  ;;  %s26_s22 = int_to_ptr.vmem [resolvable:$true] %s25_s22  ;;  %s45_s3 = int_to_ptr.vmem [resolvable:$true] %s44_s3 }
  0x27   :  { %s1370_s24 = scalar_lea.vmem %s26_s22, 256  ;;  %p1375_p2 = scmp.lt.s32.totalorder %s26_s22, %s26_s22 }
  0x28   :  { %p1371_p1 = scmp.ne.s32.totalorder %s26_s22, %s1370_s24  ;;  %p1376_p3 = scmp.lt.s32.totalorder %s1370_s24, %s1370_s24 }
  0x2a   :  { %p1377_p4 = por %p1376_p3, %p1375_p2 }
  0x2c   :  { %p1378_p5 = pnand %p1377_p4, %p1371_p1 }
  0x2e   :  { %1381 = shalt.err (!%p1378_p5)
}
  0x2f   :  { %28 = dma.hbm_to_vmem [thread:$0]  %s1631_s0, 256, %s26_s22, [#allocation3]  }
  0x30   :  { %s1390_s27 = scalar_lea.vmem %s45_s3, 8192  ;;  %p1395_p7 = scmp.lt.s32.totalorder %s45_s3, %s45_s3 }
  0x31   :  { %p1391_p6 = scmp.ne.s32.totalorder %s45_s3, %s1390_s27  ;;  %p1396_p8 = scmp.lt.s32.totalorder %s1390_s27, %s1390_s27 }
  0x33   :  { %p1397_p9 = por %p1396_p8, %p1395_p7 }
  0x35   :  { %p1398_p10 = pnand %p1397_p9, %p1391_p6 }
  0x37   :  { %1401 = shalt.err (!%p1398_p10)
}
  0x38   :  { %50 = dma.hbm_to_vmem [thread:$0]  %s1633_s2, 8192, %s45_s3, [#allocation6], %s1497_s15, %s1497_s15, %s1498_s16  }
  0x39   :  { %s1501_s29 = smov [#allocation10]  }
  0x3a   :  { %s68_s30 = sshll.u32 %s1501_s29, 4  ;;  %s69_s30 = int_to_ptr.vmem [resolvable:$true] %s68_s30 }
  0x3b   :  { %s1410_s9 = scalar_lea.vmem %s69_s30, 12288  ;;  %p1415_p12 = scmp.lt.s32.totalorder %s69_s30, %s69_s30 }
  0x3c   :  { %p1411_p11 = scmp.ne.s32.totalorder %s69_s30, %s1410_s9  ;;  %p1416_p13 = scmp.lt.s32.totalorder %s1410_s9, %s1410_s9 }
  0x3e   :  { %p1417_p0 = por %p1416_p13, %p1415_p12 }
  0x40   :  { %p1418_p1 = pnand %p1417_p0, %p1411_p11 }
  0x42   :  { %1421 = shalt.err (!%p1418_p1)
}
  0x43   :  { %s1502_s0 = smov 768   ;;  %s1503_s10 = smov 48  }
  0x44   :  { %74 = dma.hbm_to_vmem [thread:$0]  %s1635_s4, 12288, %s69_s30, [#allocation9], %s1502_s0, %s1502_s0, %s1503_s10  }
  0x45   :  { %s1504_s13 = smov [#allocation13]   ;;  %s1505_s17 = smov [#allocation14]  }
  0x46   :  { %s92_s14 = sshll.u32 %s1504_s13, 4  ;;  %s104_s2 = sshll.u32 %s1505_s17, 4  ;;  %s93_s14 = int_to_ptr.vmem [resolvable:$true] %s92_s14  ;;  %s105_s2 = int_to_ptr.vmem [resolvable:$true] %s104_s2 }
  0x47   :  { %s1430_s18 = scalar_lea.vmem %s93_s14, 4096  ;;  %p1435_p3 = scmp.lt.s32.totalorder %s93_s14, %s93_s14 }
  0x48   :  { %p1431_p2 = scmp.ne.s32.totalorder %s93_s14, %s1430_s18  ;;  %p1436_p4 = scmp.lt.s32.totalorder %s1430_s18, %s1430_s18 }
  0x4a   :  { %p1437_p5 = por %p1436_p4, %p1435_p3 }
  0x4c   :  { %p1438_p6 = pnand %p1437_p5, %p1431_p2 }
  0x4e   :  { %1441 = shalt.err (!%p1438_p6)
}
  0x4f   :  { %98 = dma.hbm_to_vmem [thread:$0]  %s1637_s6, 4096, %s93_s14, [#allocation12], %s1497_s15, %s1497_s15, %s1498_s16  }
  0x50   :  { %s1450_s4 = scalar_lea.vmem %s105_s2, 8192  ;;  %p1455_p8 = scmp.lt.s32.totalorder %s105_s2, %s105_s2 }
  0x51   :  { %p1451_p7 = scmp.ne.s32.totalorder %s105_s2, %s1450_s4  ;;  %p1456_p9 = scmp.lt.s32.totalorder %s1450_s4, %s1450_s4 }
  0x53   :  { %p1457_p10 = por %p1456_p9, %p1455_p8 }
  0x55   :  { %p1458_p11 = pnand %p1457_p10, %p1451_p7 }
  0x57   :  { %1461 = shalt.err (!%p1458_p11)
}
  0x58   :  { %s1506_s20 = smov 512   ;;  %s1507_s21 = smov 32  }
  0x59   :  { %110 = dma.hbm_to_vmem [thread:$0]  %s1638_s7, 8192, %s105_s2, [#allocation15], %s1506_s20, %s1506_s20, %s1507_s21  }
  0x5a   :  { %1482 = dma.done.wait [#allocation3], 256  }
  0x5b   :  { %1483 = vsyncadd [#allocation3], 4294967040 }
  0x5c   :  { %1484 = dma.done.wait [#allocation6], 8320  }
  0x5d   :  { %1485 = vsyncadd [#allocation6], 4294958976 }
  0x5e   :  { %1486 = dma.done.wait [#allocation9], 16384  }
  0x5f   :  { %1487 = vsyncadd [#allocation9], 4294950912 }
  0x60   :  { %1488 = dma.done.wait [#allocation12], 8192  }
  0x61   :  { %1489 = vsyncadd [#allocation12], 4294959104 }
  0x62   :  { %1490 = dma.done.wait [#allocation15], 8192  }
  0x63   :  { %1491 = vsyncadd [#allocation15], 4294959104  ;;  %v169_v0 = vld [vmem:[#allocation7 + $0xf8] sm:$0xff]  ;;  %v168_v1 = vld [vmem:[#allocation7 + $0xf0] sm:$0xff]  ;;  %s1509_s6 = smov [#allocation16]  }
  0x64   :  { %v167_v2 = vld [vmem:[#allocation7 + $0xe8] sm:$0xff]  ;;  %202 = vmatprep.subr.mxu0 %v169_v0  ;;  %v166_v3 = vld [vmem:[#allocation7 + $0xe0] sm:$0xff]  ;;  %v165_v4 = vld [vmem:[#allocation7 + $0xd8] sm:$0xff]  ;;  %s1212_s7 = sshll.u32 %s1509_s6, 4  ;;  %s1213_s7 = int_to_ptr.vmem [resolvable:$true] %s1212_s7 }
  0x65   :  { %203 = vmatpush1.msra.mxu0 %v168_v1  ;;  %v164_v5 = vld [vmem:[#allocation7 + $0xd0] sm:$0xff]  ;;  %v163_v6 = vld [vmem:[#allocation7 + $0xc8] sm:$0xff]  ;;  %v162_v7 = vld [vmem:[#allocation7 + $0xc0] sm:$0xff]  ;;  %s1462_s15 = scalar_lea.vmem %s1213_s7, 128  ;;  %p1467_p13 = scmp.lt.s32.totalorder %s1213_s7, %s1213_s7 }
  0x66   :  { %204 = vmatprep.subr.mxu0 %v167_v2  ;;  %v161_v8 = vld [vmem:[#allocation7 + $0xb8] sm:$0xff]  ;;  %v160_v9 = vld [vmem:[#allocation7 + $0xb0] sm:$0xff]  ;;  %v159_v10 = vld [vmem:[#allocation7 + $0xa8] sm:$0xff]  ;;  %p1463_p12 = scmp.ne.s32.totalorder %s1213_s7, %s1462_s15  ;;  %p1468_p0 = scmp.lt.s32.totalorder %s1462_s15, %s1462_s15 }
  0x67   :  { %205 = vmatpush1.msra.mxu0 %v166_v3  ;;  %v158_v11 = vld [vmem:[#allocation7 + $0xa0] sm:$0xff]  ;;  %v157_v12 = vld [vmem:[#allocation7 + $0x98] sm:$0xff]  ;;  %v156_v13 = vld [vmem:[#allocation7 + $0x90] sm:$0xff] }
  0x68   :  { %206 = vmatprep.subr.mxu0 %v165_v4  ;;  %v155_v14 = vld [vmem:[#allocation7 + $0x88] sm:$0xff]  ;;  %v154_v15 = vld [vmem:[#allocation7 + $0x80] sm:$0xff]  ;;  %v153_v16 = vld [vmem:[#allocation7 + $0x78] sm:$0xff]  ;;  %p1469_p1 = por %p1468_p0, %p1467_p13 }
  0x69   :  { %207 = vmatpush1.msra.mxu0 %v164_v5  ;;  %v152_v17 = vld [vmem:[#allocation7 + $0x70] sm:$0xff]  ;;  %v151_v18 = vld [vmem:[#allocation7 + $0x68] sm:$0xff]  ;;  %v150_v19 = vld [vmem:[#allocation7 + $0x60] sm:$0xff] }
  0x6a   :  { %208 = vmatprep.subr.mxu0 %v163_v6  ;;  %v149_v20 = vld [vmem:[#allocation7 + $0x58] sm:$0xff]  ;;  %v148_v21 = vld [vmem:[#allocation7 + $0x50] sm:$0xff]  ;;  %v147_v22 = vld [vmem:[#allocation7 + $0x48] sm:$0xff]  ;;  %p1470_p2 = pnand %p1469_p1, %p1463_p12 }
  0x6b   :  { %209 = vmatpush1.msra.mxu0 %v162_v7  ;;  %v146_v23 = vld [vmem:[#allocation7 + $0x40] sm:$0xff]  ;;  %v136_v24 = vld [vmem:[#allocation2 + $0x8] sm:$0xff]  ;;  %v145_v25 = vld [vmem:[#allocation7 + $0x38] sm:$0xff] }
  0x6c   :  { %210 = vmatprep.subr.mxu0 %v161_v8  ;;  %266 = vmatprep.mubr.f32.mxu0 %v136_v24  ;;  %v144_v26 = vld [vmem:[#allocation7 + $0x30] sm:$0xff]  ;;  %v143_v27 = vld [vmem:[#allocation7 + $0x28] sm:$0xff]  ;;  %v142_v28 = vld [vmem:[#allocation7 + $0x20] sm:$0xff] }
  0x6d   :  { %211 = vmatpush1.msra.mxu0 %v160_v9  ;;  %v141_v29 = vld [vmem:[#allocation7 + $0x18] sm:$0xff]  ;;  %v140_v30 = vld [vmem:[#allocation7 + $0x10] sm:$0xff]  ;;  %v139_v31 = vld [vmem:[#allocation7 + $0x8] sm:$0xff] }
  0x6e   :  { %212 = vmatprep.subr.mxu0 %v159_v10  ;;  %v138_v32 = vld [vmem:[#allocation7] sm:$0xff]  ;;  %v201_v33 = vld [vmem:[#allocation7 + $0x1f8] sm:$0xff]  ;;  %v200_v34 = vld [vmem:[#allocation7 + $0x1f0] sm:$0xff] }
  0x6f   :  { %213 = vmatpush1.msra.mxu0 %v158_v11  ;;  %v199_v35 = vld [vmem:[#allocation7 + $0x1e8] sm:$0xff]  ;;  %v198_v36 = vld [vmem:[#allocation7 + $0x1e0] sm:$0xff]  ;;  %v197_v37 = vld [vmem:[#allocation7 + $0x1d8] sm:$0xff] }
  0x70   :  { %214 = vmatprep.subr.mxu0 %v157_v12  ;;  %v196_v38 = vld [vmem:[#allocation7 + $0x1d0] sm:$0xff]  ;;  %v195_v39 = vld [vmem:[#allocation7 + $0x1c8] sm:$0xff]  ;;  %v194_v40 = vld [vmem:[#allocation7 + $0x1c0] sm:$0xff] }
  0x71   :  { %215 = vmatpush1.msra.mxu0 %v156_v13  ;;  %v193_v41 = vld [vmem:[#allocation7 + $0x1b8] sm:$0xff]  ;;  %v192_v42 = vld [vmem:[#allocation7 + $0x1b0] sm:$0xff]  ;;  %v191_v43 = vld [vmem:[#allocation7 + $0x1a8] sm:$0xff] }
  0x72   :  { %216 = vmatprep.subr.mxu0 %v155_v14  ;;  %v190_v44 = vld [vmem:[#allocation7 + $0x1a0] sm:$0xff]  ;;  %v189_v45 = vld [vmem:[#allocation7 + $0x198] sm:$0xff]  ;;  %v188_v46 = vld [vmem:[#allocation7 + $0x190] sm:$0xff] }
  0x73   :  { %217 = vmatpush1.msra.mxu0 %v154_v15  ;;  %v187_v47 = vld [vmem:[#allocation7 + $0x188] sm:$0xff]  ;;  %v186_v48 = vld [vmem:[#allocation7 + $0x180] sm:$0xff]  ;;  %v185_v49 = vld [vmem:[#allocation7 + $0x178] sm:$0xff] }
  0x74   :  { %218 = vmatprep.subr.mxu0 %v153_v16  ;;  %v184_v50 = vld [vmem:[#allocation7 + $0x170] sm:$0xff]  ;;  %v183_v51 = vld [vmem:[#allocation7 + $0x168] sm:$0xff]  ;;  %v182_v52 = vld [vmem:[#allocation7 + $0x160] sm:$0xff] }
  0x75   :  { %219 = vmatpush1.msra.mxu0 %v152_v17  ;;  %v181_v53 = vld [vmem:[#allocation7 + $0x158] sm:$0xff]  ;;  %v180_v54 = vld [vmem:[#allocation7 + $0x150] sm:$0xff]  ;;  %v179_v55 = vld [vmem:[#allocation7 + $0x148] sm:$0xff] }
  0x76   :  { %220 = vmatprep.subr.mxu0 %v151_v18  ;;  %v178_v56 = vld [vmem:[#allocation7 + $0x140] sm:$0xff]  ;;  %v177_v57 = vld [vmem:[#allocation7 + $0x138] sm:$0xff]  ;;  %v176_v58 = vld [vmem:[#allocation7 + $0x130] sm:$0xff] }
  0x77   :  { %221 = vmatpush1.msra.mxu0 %v150_v19  ;;  %v175_v59 = vld [vmem:[#allocation7 + $0x128] sm:$0xff]  ;;  %v174_v60 = vld [vmem:[#allocation7 + $0x120] sm:$0xff]  ;;  %v173_v61 = vld [vmem:[#allocation7 + $0x118] sm:$0xff] }
  0x78   :  { %222 = vmatprep.subr.mxu0 %v149_v20  ;;  %v172_v62 = vld [vmem:[#allocation7 + $0x110] sm:$0xff]  ;;  %v171_v63 = vld [vmem:[#allocation7 + $0x108] sm:$0xff]  ;;  %v170_v0 = vld [vmem:[#allocation7 + $0x100] sm:$0xff]  ;;  %v1508_v20 = vmov 0.0  }
  0x79   :  { %223 = vmatpush1.msra.mxu0 %v148_v21  ;;  %v135_v1 = vld [vmem:[#allocation2] sm:$0xff]  ;;  %v314_v2 = vld [vmem:[#allocation8 + $0xf8] sm:$0xff]  ;;  %v313_v3 = vld [vmem:[#allocation8 + $0xf0] sm:$0xff]  ;;  %379 = vmatprep.mubr.f32.mxu1 %v1508_v20 }
  0x7a   :  { %224 = vmatprep.subr.mxu0 %v147_v22  ;;  %315 = vmatprep.subr.mxu1 %v314_v2  ;;  %v312_v4 = vld [vmem:[#allocation8 + $0xe8] sm:$0xff]  ;;  %v311_v5 = vld [vmem:[#allocation8 + $0xe0] sm:$0xff]  ;;  %v310_v6 = vld [vmem:[#allocation8 + $0xd8] sm:$0xff] }
  0x7b   :  { %225 = vmatpush1.msra.mxu0 %v146_v23  ;;  %316 = vmatpush1.msra.mxu1 %v313_v3  ;;  %v309_v7 = vld [vmem:[#allocation8 + $0xd0] sm:$0xff]  ;;  %v308_v8 = vld [vmem:[#allocation8 + $0xc8] sm:$0xff]  ;;  %v307_v9 = vld [vmem:[#allocation8 + $0xc0] sm:$0xff] }
  0x7c   :  { %226 = vmatprep.subr.mxu0 %v145_v25  ;;  %317 = vmatprep.subr.mxu1 %v312_v4  ;;  %v306_v10 = vld [vmem:[#allocation8 + $0xb8] sm:$0xff]  ;;  %v305_v11 = vld [vmem:[#allocation8 + $0xb0] sm:$0xff]  ;;  %v304_v12 = vld [vmem:[#allocation8 + $0xa8] sm:$0xff] }
  0x7d   :  { %227 = vmatpush1.msra.mxu0 %v144_v26  ;;  %318 = vmatpush1.msra.mxu1 %v311_v5  ;;  %v303_v13 = vld [vmem:[#allocation8 + $0xa0] sm:$0xff]  ;;  %v302_v14 = vld [vmem:[#allocation8 + $0x98] sm:$0xff]  ;;  %v301_v15 = vld [vmem:[#allocation8 + $0x90] sm:$0xff] }
  0x7e   :  { %228 = vmatprep.subr.mxu0 %v143_v27  ;;  %319 = vmatprep.subr.mxu1 %v310_v6  ;;  %v300_v16 = vld [vmem:[#allocation8 + $0x88] sm:$0xff]  ;;  %v299_v17 = vld [vmem:[#allocation8 + $0x80] sm:$0xff]  ;;  %v298_v18 = vld [vmem:[#allocation8 + $0x78] sm:$0xff] }
  0x7f   :  { %229 = vmatpush1.msra.mxu0 %v142_v28  ;;  %320 = vmatpush1.msra.mxu1 %v309_v7  ;;  %v297_v19 = vld [vmem:[#allocation8 + $0x70] sm:$0xff]  ;;  %v296_v21 = vld [vmem:[#allocation8 + $0x68] sm:$0xff]  ;;  %v295_v22 = vld [vmem:[#allocation8 + $0x60] sm:$0xff] }
  0x80   :  { %230 = vmatprep.subr.mxu0 %v141_v29  ;;  %321 = vmatprep.subr.mxu1 %v308_v8  ;;  %v294_v23 = vld [vmem:[#allocation8 + $0x58] sm:$0xff]  ;;  %v293_v24 = vld [vmem:[#allocation8 + $0x50] sm:$0xff]  ;;  %v292_v25 = vld [vmem:[#allocation8 + $0x48] sm:$0xff] }
  0x81   :  { %231 = vmatpush1.msra.mxu0 %v140_v30  ;;  %322 = vmatpush1.msra.mxu1 %v307_v9  ;;  %v291_v26 = vld [vmem:[#allocation8 + $0x40] sm:$0xff]  ;;  %v290_v27 = vld [vmem:[#allocation8 + $0x38] sm:$0xff]  ;;  %v289_v28 = vld [vmem:[#allocation8 + $0x30] sm:$0xff] }
  0x82   :  { %232 = vmatprep.subr.mxu0 %v139_v31  ;;  %323 = vmatprep.subr.mxu1 %v306_v10  ;;  %v288_v29 = vld [vmem:[#allocation8 + $0x28] sm:$0xff]  ;;  %v287_v30 = vld [vmem:[#allocation8 + $0x20] sm:$0xff]  ;;  %v286_v31 = vld [vmem:[#allocation8 + $0x18] sm:$0xff] }
  0x83   :  { %233 = vmatpush1.msra.mxu0 %v138_v32  ;;  %324 = vmatpush1.msra.mxu1 %v305_v11  ;;  %v285_v32 = vld [vmem:[#allocation8 + $0x10] sm:$0xff]  ;;  %v470_v2 = vld [vmem:[#allocation10 + $0x220] sm:$0xff]  ;;  %v465_v4 = vld [vmem:[#allocation10 + $0x1f8] sm:$0xff] }
  0x84   :  { %234 = vmatprep.subr.mxu0 %v201_v33  ;;  %325 = vmatprep.subr.mxu1 %v304_v12  ;;  %v284_v33 = vld [vmem:[#allocation8 + $0x8] sm:$0xff]  ;;  %v462_v3 = vld [vmem:[#allocation10 + $0x1e0] sm:$0xff]  ;;  %v457_v5 = vld [vmem:[#allocation10 + $0x1b8] sm:$0xff] }
  0x85   :  { %235 = vmatpush2.msra.mxu0 %v200_v34  ;;  %326 = vmatpush1.msra.mxu1 %v303_v13  ;;  %v283_v34 = vld [vmem:[#allocation8] sm:$0xff]  ;;  %v464_v6 = vld [vmem:[#allocation10 + $0x1f0] sm:$0xff]  ;;  %v459_v8 = vld [vmem:[#allocation10 + $0x1c8] sm:$0xff] }
  0x86   :  { %236 = vmatprep.subr.mxu0 %v199_v35  ;;  %327 = vmatprep.subr.mxu1 %v302_v14  ;;  %v456_v7 = vld [vmem:[#allocation10 + $0x1b0] sm:$0xff]  ;;  %v451_v9 = vld [vmem:[#allocation10 + $0x188] sm:$0xff]  ;;  %v458_v10 = vld [vmem:[#allocation10 + $0x1c0] sm:$0xff] }
  0x87   :  { %237 = vmatpush2.msra.mxu0 %v198_v36  ;;  %328 = vmatpush1.msra.mxu1 %v301_v15  ;;  %v450_v11 = vld [vmem:[#allocation10 + $0x180] sm:$0xff]  ;;  %v453_v12 = vld [vmem:[#allocation10 + $0x198] sm:$0xff]  ;;  %v452_v14 = vld [vmem:[#allocation10 + $0x190] sm:$0xff] }
  0x88   :  { %238 = vmatprep.subr.mxu0 %v197_v37  ;;  %329 = vmatprep.subr.mxu1 %v300_v16  ;;  %v445_v13 = vld [vmem:[#allocation10 + $0x158] sm:$0xff]  ;;  %v444_v15 = vld [vmem:[#allocation10 + $0x150] sm:$0xff]  ;;  %v447_v16 = vld [vmem:[#allocation10 + $0x168] sm:$0xff] }
  0x89   :  { %239 = vmatpush2.msra.mxu0 %v196_v38  ;;  %330 = vmatpush1.msra.mxu1 %v299_v17  ;;  %v439_v17 = vld [vmem:[#allocation10 + $0x128] sm:$0xff] }
  0x8a   :  { %240 = vmatprep.subr.mxu0 %v195_v39  ;;  %331 = vmatprep.subr.mxu1 %v298_v18  ;;  %v446_v18 = vld [vmem:[#allocation10 + $0x160] sm:$0xff] }
  0x8b   :  { %241 = vmatpush2.msra.mxu0 %v194_v40  ;;  %332 = vmatpush1.msra.mxu1 %v297_v19  ;;  %v438_v19 = vld [vmem:[#allocation10 + $0x120] sm:$0xff] }
  0x8c   :  { %242 = vmatprep.subr.mxu0 %v193_v41  ;;  %333 = vmatprep.subr.mxu1 %v296_v21  ;;  %v137_v41 = vld [vmem:[#allocation5] sm:$0xff] }
  0x8d   :  { %243 = vmatpush2.msra.mxu0 %v192_v42  ;;  %334 = vmatpush1.msra.mxu1 %v295_v22  ;;  %v441_v21 = vld [vmem:[#allocation10 + $0x138] sm:$0xff] }
  0x8e   :  { %244 = vmatprep.subr.mxu0 %v191_v43  ;;  %335 = vmatprep.subr.mxu1 %v294_v23  ;;  %v433_v22 = vld [vmem:[#allocation10 + $0xf8] sm:$0xff]  ;;  %v440_v23 = vld [vmem:[#allocation10 + $0x130] sm:$0xff] }
  0x8f   :  { %245 = vmatpush2.msra.mxu0 %v190_v44  ;;  %336 = vmatpush1.msra.mxu1 %v293_v24  ;;  %v432_v24 = vld [vmem:[#allocation10 + $0xf0] sm:$0xff] }
  0x90   :  { %246 = vmatprep.subr.mxu0 %v189_v45  ;;  %337 = vmatprep.subr.mxu1 %v292_v25  ;;  %v435_v25 = vld [vmem:[#allocation10 + $0x108] sm:$0xff] }
  0x91   :  { %247 = vmatpush2.msra.mxu0 %v188_v46  ;;  %338 = vmatpush1.msra.mxu1 %v291_v26  ;;  %v493_v46 = vld [vmem:[#allocation10 + $0x2d8] sm:$0xff]  ;;  %v427_v26 = vld [vmem:[#allocation10 + $0xc8] sm:$0xff] }
  0x92   :  { %248 = vmatprep.subr.mxu0 %v187_v47  ;;  %339 = vmatprep.subr.mxu1 %v290_v27  ;;  %v492_v47 = vld [vmem:[#allocation10 + $0x2d0] sm:$0xff]  ;;  %v434_v27 = vld [vmem:[#allocation10 + $0x100] sm:$0xff] }
  0x93   :  { %249 = vmatpush2.msra.mxu0 %v186_v48  ;;  %340 = vmatpush1.msra.mxu1 %v289_v28  ;;  %v495_v48 = vld [vmem:[#allocation10 + $0x2e8] sm:$0xff]  ;;  %v426_v28 = vld [vmem:[#allocation10 + $0xc0] sm:$0xff] }
  0x94   :  { %250 = vmatprep.subr.mxu0 %v185_v49  ;;  %341 = vmatprep.subr.mxu1 %v288_v29  ;;  %v487_v49 = vld [vmem:[#allocation10 + $0x2a8] sm:$0xff]  ;;  %v429_v29 = vld [vmem:[#allocation10 + $0xd8] sm:$0xff] }
  0x95   :  { %251 = vmatpush2.msra.mxu0 %v184_v50  ;;  %342 = vmatpush1.msra.mxu1 %v287_v30  ;;  %v494_v50 = vld [vmem:[#allocation10 + $0x2e0] sm:$0xff]  ;;  %v421_v30 = vld [vmem:[#allocation10 + $0x98] sm:$0xff] }
  0x96   :  { %252 = vmatprep.subr.mxu0 %v183_v51  ;;  %343 = vmatprep.subr.mxu1 %v286_v31  ;;  %v486_v51 = vld [vmem:[#allocation10 + $0x2a0] sm:$0xff]  ;;  %v428_v31 = vld [vmem:[#allocation10 + $0xd0] sm:$0xff] }
  0x97   :  { %253 = vmatpush2.msra.mxu0 %v182_v52  ;;  %344 = vmatpush1.msra.mxu1 %v285_v32  ;;  %v489_v52 = vld [vmem:[#allocation10 + $0x2b8] sm:$0xff]  ;;  %v420_v32 = vld [vmem:[#allocation10 + $0x90] sm:$0xff] }
  0x98   :  { %254 = vmatprep.subr.mxu0 %v181_v53  ;;  %345 = vmatprep.subr.mxu1 %v284_v33  ;;  %v481_v53 = vld [vmem:[#allocation10 + $0x278] sm:$0xff]  ;;  %v423_v33 = vld [vmem:[#allocation10 + $0xa8] sm:$0xff] }
  0x99   :  { %255 = vmatpush2.msra.mxu0 %v180_v54  ;;  %346 = vmatpush1.msra.mxu1 %v283_v34  ;;  %v488_v54 = vld [vmem:[#allocation10 + $0x2b0] sm:$0xff]  ;;  %v415_v34 = vld [vmem:[#allocation10 + $0x68] sm:$0xff] }
  0x9a   :  { %256 = vmatprep.subr.mxu0 %v179_v55  ;;  %498 = vmatprep.subr.mxu1 %v493_v46  ;;  %v480_v55 = vld [vmem:[#allocation10 + $0x270] sm:$0xff]  ;;  %v405_v46 = vld [vmem:[#allocation10 + $0x18] sm:$0xff] }
  0x9b   :  { %257 = vmatpush2.msra.mxu0 %v178_v56  ;;  %v483_v56 = vld [vmem:[#allocation10 + $0x288] sm:$0xff] }
  0x9c   :  { %258 = vmatprep.subr.mxu0 %v177_v57  ;;  %v475_v57 = vld [vmem:[#allocation10 + $0x248] sm:$0xff] }
  0x9d   :  { %259 = vmatpush2.msra.mxu0 %v176_v58  ;;  %v482_v58 = vld [vmem:[#allocation10 + $0x280] sm:$0xff] }
  0x9e   :  { %260 = vmatprep.subr.mxu0 %v175_v59  ;;  %v474_v59 = vld [vmem:[#allocation10 + $0x240] sm:$0xff] }
  0x9f   :  { %261 = vmatpush2.msra.mxu0 %v174_v60  ;;  %v477_v60 = vld [vmem:[#allocation10 + $0x258] sm:$0xff] }
  0xa0   :  { %262 = vmatprep.subr.mxu0 %v173_v61  ;;  %v469_v61 = vld [vmem:[#allocation10 + $0x218] sm:$0xff] }
  0xa1   :  { %263 = vmatpush2.msra.mxu0 %v172_v62  ;;  %v476_v62 = vld [vmem:[#allocation10 + $0x250] sm:$0xff] }
  0xa2   :  { %264 = vmatprep.subr.mxu0 %v171_v63  ;;  %v468_v63 = vld [vmem:[#allocation10 + $0x210] sm:$0xff] }
  0xa3   :  { %265 = vmatpush2.msra.mxu0 %v170_v0  ;;  %v471_v0 = vld [vmem:[#allocation10 + $0x228] sm:$0xff] }
  0xa4   :  { %267 = vmatmul.mubr.f32.vlgmr.msra.gmra.mxu0 %v135_v1  ;;  %569 = vmatprep.subr.mxu0 %v495_v48  ;;  %v463_v1 = vld [vmem:[#allocation10 + $0x1e8] sm:$0xff]  ;;  %v497_v48 = vld [vmem:[#allocation10 + $0x2f8] sm:$0xff] }
  0xa5   :  { %633 = vmatprep.mubr.f32.mxu0 %v1508_v20  ;;  %570 = vmatpush1.msra.mxu0 %v494_v50 }
  0xa6   :  { %571 = vmatprep.subr.mxu0 %v489_v52 }
  0xa7   :  { %572 = vmatpush1.msra.mxu0 %v488_v54 }
  0xa8   :  { %573 = vmatprep.subr.mxu0 %v483_v56 }
  0xa9   :  { %574 = vmatpush1.msra.mxu0 %v482_v58 }
  0xaa   :  { %575 = vmatprep.subr.mxu0 %v477_v60 }
  0xab   :  { %576 = vmatpush1.msra.mxu0 %v476_v62  ;;  %v496_v62 = vld [vmem:[#allocation10 + $0x2f0] sm:$0xff] }
  0xac   :  { %577 = vmatprep.subr.mxu0 %v471_v0  ;;  %v490_v0 = vld [vmem:[#allocation10 + $0x2c0] sm:$0xff] }
  0xad   :  { %578 = vmatpush1.msra.mxu0 %v470_v2  ;;  %v484_v2 = vld [vmem:[#allocation10 + $0x290] sm:$0xff] }
  0xae   :  { %579 = vmatprep.subr.mxu0 %v465_v4  ;;  %v473_v4 = vld [vmem:[#allocation10 + $0x238] sm:$0xff] }
  0xaf   :  { %580 = vmatpush1.msra.mxu0 %v464_v6  ;;  %v467_v6 = vld [vmem:[#allocation10 + $0x208] sm:$0xff] }
  0xb0   :  { %581 = vmatprep.subr.mxu0 %v459_v8  ;;  %v461_v8 = vld [vmem:[#allocation10 + $0x1d8] sm:$0xff] }
  0xb1   :  { %582 = vmatpush1.msra.mxu0 %v458_v10  ;;  %v455_v10 = vld [vmem:[#allocation10 + $0x1a8] sm:$0xff] }
  0xb2   :  { %583 = vmatprep.subr.mxu0 %v453_v12  ;;  %v449_v12 = vld [vmem:[#allocation10 + $0x178] sm:$0xff] }
  0xb3   :  { %584 = vmatpush1.msra.mxu0 %v452_v14  ;;  %v443_v14 = vld [vmem:[#allocation10 + $0x148] sm:$0xff] }
  0xb4   :  { %585 = vmatprep.subr.mxu0 %v447_v16  ;;  %v437_v16 = vld [vmem:[#allocation10 + $0x118] sm:$0xff] }
  0xb5   :  { %586 = vmatpush1.msra.mxu0 %v446_v18  ;;  %v431_v18 = vld [vmem:[#allocation10 + $0xe8] sm:$0xff] }
  0xb6   :  { %587 = vmatprep.subr.mxu0 %v441_v21  ;;  %v425_v21 = vld [vmem:[#allocation10 + $0xb8] sm:$0xff] }
  0xb7   :  { %588 = vmatpush1.msra.mxu0 %v440_v23  ;;  %v419_v23 = vld [vmem:[#allocation10 + $0x88] sm:$0xff] }
  0xb8   :  { %589 = vmatprep.subr.mxu0 %v435_v25  ;;  %v413_v25 = vld [vmem:[#allocation10 + $0x58] sm:$0xff] }
  0xb9   :  { %590 = vmatpush1.msra.mxu0 %v434_v27  ;;  %v407_v27 = vld [vmem:[#allocation10 + $0x28] sm:$0xff] }
  0xba   :  { %591 = vmatprep.subr.mxu0 %v429_v29  ;;  %v774_v29 = vld [vmem:[#allocation11 + $0xf8] sm:$0xff] }
  0xbb   :  { %592 = vmatpush1.msra.mxu0 %v428_v31  ;;  %v773_v31 = vld [vmem:[#allocation11 + $0xf0] sm:$0xff] }
  0xbc   :  { %593 = vmatprep.subr.mxu0 %v423_v33  ;;  %v772_v33 = vld [vmem:[#allocation11 + $0xe8] sm:$0xff] }
 0x164   :  { %v268_v35 = vpop.f32.mrf.mxu0 }
 0x165   :  { %v1225_v36 = vmul.f32 -1.442695, %v268_v35  ;;  %v422_v35 = vld [vmem:[#allocation10 + $0xa0] sm:$0xff] }
 0x166   :  { %v270_v37 = vpop.f32.mrf.mxu0  ;;  %594 = vmatpush1.msra.mxu0 %v422_v35  ;;  %v771_v35 = vld [vmem:[#allocation11 + $0xe0] sm:$0xff] }
 0x167   :  { %1252 = vpow2.f32 %v1225_v36  ;;  %v414_v36 = vld [vmem:[#allocation10 + $0x60] sm:$0xff] }
 0x168   :  { %1254 = vtanh.f32 %v270_v37  ;;  %v417_v37 = vld [vmem:[#allocation10 + $0x78] sm:$0xff] }
 0x169   :  { %595 = vmatprep.subr.mxu0 %v417_v37  ;;  %v770_v37 = vld [vmem:[#allocation11 + $0xd8] sm:$0xff] }
 0x174   :  { %v1253_v38 = vpop.eup %1252 }
 0x175   :  { %v276_v39 = vadd.f32 1.0, %v1253_v38  ;;  %v1255_v40 = vpop.eup %1254  ;;  %v409_v38 = vld [vmem:[#allocation10 + $0x38] sm:$0xff] }
 0x176   :  { %v280_v42 = vsub.f32 %v1255_v40, %v137_v41  ;;  %v408_v40 = vld [vmem:[#allocation10 + $0x30] sm:$0xff] }
 0x177   :  { %1256 = vrcp.f32 %v276_v39  ;;  %v416_v39 = vld [vmem:[#allocation10 + $0x70] sm:$0xff] }
 0x178   :  { %596 = vmatpush1.msra.mxu0 %v416_v39  ;;  %v769_v39 = vld [vmem:[#allocation11 + $0xd0] sm:$0xff] }
 0x184   :  { %v1257_v43 = vpop.eup %1256 }
 0x185   :  { %v281_v44 = vmul.f32 %v1257_v43, %v280_v42  ;;  %v403_v42 = vld [vmem:[#allocation10 + $0x8] sm:$0xff]  ;;  %v410_v43 = vld [vmem:[#allocation10 + $0x40] sm:$0xff] }
 0x187   :  { %v1593_v45 = vadd.f32 %v281_v44, %v137_v41  ;;  %v411_v41 = vld [vmem:[#allocation10 + $0x48] sm:$0xff]  ;;  %v402_v44 = vld [vmem:[#allocation10] sm:$0xff] }
 0x188   :  { %597 = vmatprep.subr.mxu0 %v411_v41  ;;  %v768_v41 = vld [vmem:[#allocation11 + $0xc8] sm:$0xff] }
 0x189   :  { %380 = vmatmul.mubr.f32.vlgmr.msra.gmra.mxu1 %v1593_v45  ;;  %598 = vmatpush1.msra.mxu0 %v410_v43  ;;  %v767_v43 = vld [vmem:[#allocation11 + $0xc0] sm:$0xff] }
 0x18a   :  { %562 = vmatprep.mubr.f32.mxu1 %v1508_v20  ;;  %499 = vmatpush1.msra.mxu1 %v492_v47  ;;  %v404_v47 = vld [vmem:[#allocation10 + $0x10] sm:$0xff] }
 0x18b   :  { %500 = vmatprep.subr.mxu1 %v487_v49  ;;  %599 = vmatprep.subr.mxu0 %v405_v46  ;;  %v766_v46 = vld [vmem:[#allocation11 + $0xb8] sm:$0xff] }
 0x18c   :  { %501 = vmatpush1.msra.mxu1 %v486_v51  ;;  %600 = vmatpush1.msra.mxu0 %v404_v47  ;;  %v880_v47 = vld [vmem:[#allocation13 + $0xb8] sm:$0xff] }
 0x18d   :  { %502 = vmatprep.subr.mxu1 %v481_v53  ;;  %775 = vmatprep.subr.mxu0 %v774_v29  ;;  %v743_v29 = vld [vmem:[#allocation11] sm:$0xff] }
 0x18e   :  { %503 = vmatpush1.msra.mxu1 %v480_v55 }
 0x18f   :  { %504 = vmatprep.subr.mxu1 %v475_v57 }
 0x190   :  { %505 = vmatpush1.msra.mxu1 %v474_v59 }
 0x191   :  { %506 = vmatprep.subr.mxu1 %v469_v61 }
 0x192   :  { %507 = vmatpush1.msra.mxu1 %v468_v63  ;;  %v491_v63 = vld [vmem:[#allocation10 + $0x2c8] sm:$0xff] }
 0x193   :  { %508 = vmatprep.subr.mxu1 %v463_v1  ;;  %v485_v1 = vld [vmem:[#allocation10 + $0x298] sm:$0xff] }
 0x194   :  { %509 = vmatpush1.msra.mxu1 %v462_v3  ;;  %v479_v3 = vld [vmem:[#allocation10 + $0x268] sm:$0xff] }
 0x195   :  { %510 = vmatprep.subr.mxu1 %v457_v5  ;;  %v472_v5 = vld [vmem:[#allocation10 + $0x230] sm:$0xff] }
 0x196   :  { %511 = vmatpush1.msra.mxu1 %v456_v7  ;;  %v466_v7 = vld [vmem:[#allocation10 + $0x200] sm:$0xff] }
 0x197   :  { %512 = vmatprep.subr.mxu1 %v451_v9  ;;  %v460_v9 = vld [vmem:[#allocation10 + $0x1d0] sm:$0xff] }
 0x198   :  { %513 = vmatpush1.msra.mxu1 %v450_v11  ;;  %v454_v11 = vld [vmem:[#allocation10 + $0x1a0] sm:$0xff] }
 0x199   :  { %514 = vmatprep.subr.mxu1 %v445_v13  ;;  %v448_v13 = vld [vmem:[#allocation10 + $0x170] sm:$0xff] }
 0x19a   :  { %515 = vmatpush1.msra.mxu1 %v444_v15  ;;  %v442_v15 = vld [vmem:[#allocation10 + $0x140] sm:$0xff] }
 0x19b   :  { %516 = vmatprep.subr.mxu1 %v439_v17  ;;  %v436_v17 = vld [vmem:[#allocation10 + $0x110] sm:$0xff] }
 0x19c   :  { %517 = vmatpush1.msra.mxu1 %v438_v19  ;;  %v430_v19 = vld [vmem:[#allocation10 + $0xe0] sm:$0xff] }
 0x19d   :  { %518 = vmatprep.subr.mxu1 %v433_v22  ;;  %v424_v22 = vld [vmem:[#allocation10 + $0xb0] sm:$0xff] }
 0x19e   :  { %519 = vmatpush1.msra.mxu1 %v432_v24  ;;  %v418_v24 = vld [vmem:[#allocation10 + $0x80] sm:$0xff] }
 0x19f   :  { %520 = vmatprep.subr.mxu1 %v427_v26  ;;  %v412_v26 = vld [vmem:[#allocation10 + $0x50] sm:$0xff] }
 0x1a0   :  { %521 = vmatpush1.msra.mxu1 %v426_v28  ;;  %v406_v28 = vld [vmem:[#allocation10 + $0x20] sm:$0xff] }
 0x1a1   :  { %522 = vmatprep.subr.mxu1 %v421_v30  ;;  %v888_v30 = vld [vmem:[#allocation13 + $0xf8] sm:$0xff] }
 0x1a2   :  { %523 = vmatpush1.msra.mxu1 %v420_v32  ;;  %v887_v32 = vld [vmem:[#allocation13 + $0xf0] sm:$0xff] }
 0x1a3   :  { %524 = vmatprep.subr.mxu1 %v415_v34  ;;  %v886_v34 = vld [vmem:[#allocation13 + $0xe8] sm:$0xff] }
 0x1a4   :  { %525 = vmatpush1.msra.mxu1 %v414_v36  ;;  %v885_v36 = vld [vmem:[#allocation13 + $0xe0] sm:$0xff] }
 0x1a5   :  { %526 = vmatprep.subr.mxu1 %v409_v38  ;;  %v884_v38 = vld [vmem:[#allocation13 + $0xd8] sm:$0xff] }
 0x1a6   :  { %527 = vmatpush1.msra.mxu1 %v408_v40  ;;  %v883_v40 = vld [vmem:[#allocation13 + $0xd0] sm:$0xff] }
 0x1a7   :  { %528 = vmatprep.subr.mxu1 %v403_v42  ;;  %v882_v42 = vld [vmem:[#allocation13 + $0xc8] sm:$0xff] }
 0x1a8   :  { %529 = vmatpush1.msra.mxu1 %v402_v44  ;;  %v881_v44 = vld [vmem:[#allocation13 + $0xc0] sm:$0xff] }
 0x1a9   :  { %640 = vmatprep.subr.mxu1 %v497_v48  ;;  %v765_v48 = vld [vmem:[#allocation11 + $0xb0] sm:$0xff] }
 0x249   :  { %v381_v49 = vpop.f32.mrf.mxu1 }
 0x24a   :  { %v1226_v50 = vmul.f32 -1.442695, %v381_v49  ;;  %v879_v49 = vld [vmem:[#allocation13 + $0xb0] sm:$0xff] }
 0x24b   :  { %v383_v51 = vpop.f32.mrf.mxu1 }
 0x24c   :  { %1258 = vpow2.f32 %v1226_v50  ;;  %v1227_v52 = vmul.f32 -1.442695, %v383_v51  ;;  %v764_v50 = vld [vmem:[#allocation11 + $0xa8] sm:$0xff] }
 0x24d   :  { %v878_v51 = vld [vmem:[#allocation13 + $0xa8] sm:$0xff] }
 0x24e   :  { %1260 = vpow2.f32 %v1227_v52  ;;  %v763_v52 = vld [vmem:[#allocation11 + $0xa0] sm:$0xff] }
 0x259   :  { %v1259_v53 = vpop.eup %1258 }
 0x25a   :  { %v389_v55 = vadd.f32 1.0, %v1259_v53  ;;  %v877_v53 = vld [vmem:[#allocation13 + $0xa0] sm:$0xff] }
 0x25b   :  { %v1261_v54 = vpop.eup %1260 }
 0x25c   :  { %v395_v56 = vadd.f32 1.0, %v1261_v54  ;;  %v762_v54 = vld [vmem:[#allocation11 + $0x98] sm:$0xff] }
 0x25e   :  { %1262 = vrcp.f32 %v395_v56  ;;  %v761_v56 = vld [vmem:[#allocation11 + $0x90] sm:$0xff] }
 0x25f   :  { %1264 = vrcp.f32 %v389_v55  ;;  %v876_v55 = vld [vmem:[#allocation13 + $0x98] sm:$0xff] }
 0x26b   :  { %v1263_v57 = vpop.eup %1262 }
 0x26c   :  { %v398_v58 = vsub.f32 %v1263_v57, %v1593_v45  ;;  %v1265_v59 = vpop.eup %1264  ;;  %v875_v57 = vld [vmem:[#allocation13 + $0x90] sm:$0xff] }
 0x26e   :  { %v399_v60 = vmul.f32 %v1265_v59, %v398_v58  ;;  %v760_v58 = vld [vmem:[#allocation11 + $0x88] sm:$0xff] }
 0x26f   :  { %v874_v59 = vld [vmem:[#allocation13 + $0x88] sm:$0xff] }
 0x270   :  { %v1599_v61 = vadd.f32 %v399_v60, %v1593_v45  ;;  %v478_v45 = vld [vmem:[#allocation10 + $0x260] sm:$0xff] }
 0x271   :  { %v759_v60 = vld [vmem:[#allocation11 + $0x80] sm:$0xff] }
 0x272   :  { %563 = vmatmul.mubr.f32.vlgmr.msra.gmra.mxu1 %v1599_v61  ;;  %634 = vmatmul.mubr.f32.vlgmr.msra.gmra.mxu0 %v1599_v61 }
 0x273   :  { %641 = vmatpush1.msra.mxu1 %v496_v62  ;;  %704 = vmatprep.mubr.f32.mxu1 %v1508_v20  ;;  %v873_v62 = vld [vmem:[#allocation13 + $0x80] sm:$0xff] }
 0x274   :  { %642 = vmatprep.subr.mxu1 %v491_v63  ;;  %839 = vmatprep.mubr.f32.mxu0 %v1508_v20  ;;  %v758_v63 = vld [vmem:[#allocation11 + $0x78] sm:$0xff] }
 0x275   :  { %643 = vmatpush1.msra.mxu1 %v490_v0  ;;  %776 = vmatpush1.msra.mxu0 %v773_v31  ;;  %v872_v0 = vld [vmem:[#allocation13 + $0x78] sm:$0xff] }
 0x276   :  { %644 = vmatprep.subr.mxu1 %v485_v1  ;;  %777 = vmatprep.subr.mxu0 %v772_v33  ;;  %v757_v1 = vld [vmem:[#allocation11 + $0x70] sm:$0xff] }
 0x277   :  { %645 = vmatpush1.msra.mxu1 %v484_v2  ;;  %778 = vmatpush1.msra.mxu0 %v771_v35  ;;  %v871_v2 = vld [vmem:[#allocation13 + $0x70] sm:$0xff] }
 0x278   :  { %646 = vmatprep.subr.mxu1 %v479_v3  ;;  %779 = vmatprep.subr.mxu0 %v770_v37  ;;  %v756_v3 = vld [vmem:[#allocation11 + $0x68] sm:$0xff] }
 0x279   :  { %647 = vmatpush1.msra.mxu1 %v478_v45  ;;  %780 = vmatpush1.msra.mxu0 %v769_v39  ;;  %v870_v45 = vld [vmem:[#allocation13 + $0x68] sm:$0xff] }
 0x27a   :  { %648 = vmatprep.subr.mxu1 %v473_v4  ;;  %781 = vmatprep.subr.mxu0 %v768_v41  ;;  %v755_v4 = vld [vmem:[#allocation11 + $0x60] sm:$0xff] }
 0x27b   :  { %649 = vmatpush1.msra.mxu1 %v472_v5  ;;  %782 = vmatpush1.msra.mxu0 %v767_v43  ;;  %v869_v5 = vld [vmem:[#allocation13 + $0x60] sm:$0xff] }
 0x27c   :  { %650 = vmatprep.subr.mxu1 %v467_v6  ;;  %783 = vmatprep.subr.mxu0 %v766_v46  ;;  %v754_v6 = vld [vmem:[#allocation11 + $0x58] sm:$0xff] }
 0x27d   :  { %651 = vmatpush1.msra.mxu1 %v466_v7  ;;  %784 = vmatpush1.msra.mxu0 %v765_v48  ;;  %v868_v7 = vld [vmem:[#allocation13 + $0x58] sm:$0xff] }
 0x27e   :  { %652 = vmatprep.subr.mxu1 %v461_v8  ;;  %785 = vmatprep.subr.mxu0 %v764_v50  ;;  %v753_v8 = vld [vmem:[#allocation11 + $0x50] sm:$0xff] }
 0x27f   :  { %653 = vmatpush1.msra.mxu1 %v460_v9  ;;  %786 = vmatpush1.msra.mxu0 %v763_v52  ;;  %v867_v9 = vld [vmem:[#allocation13 + $0x50] sm:$0xff]  ;;  %v1032_v52 = vld [vmem:[#allocation14 + $0x1e8] sm:$0xff] }
 0x280   :  { %654 = vmatprep.subr.mxu1 %v455_v10  ;;  %787 = vmatprep.subr.mxu0 %v762_v54  ;;  %v752_v10 = vld [vmem:[#allocation11 + $0x48] sm:$0xff]  ;;  %v1031_v54 = vld [vmem:[#allocation14 + $0x1e0] sm:$0xff] }
 0x281   :  { %655 = vmatpush1.msra.mxu1 %v454_v11  ;;  %788 = vmatpush1.msra.mxu0 %v761_v56  ;;  %v866_v11 = vld [vmem:[#allocation13 + $0x48] sm:$0xff] }
 0x282   :  { %656 = vmatprep.subr.mxu1 %v449_v12  ;;  %789 = vmatprep.subr.mxu0 %v760_v58  ;;  %v751_v12 = vld [vmem:[#allocation11 + $0x40] sm:$0xff]  ;;  %v1028_v56 = vld [vmem:[#allocation14 + $0x1c8] sm:$0xff] }
 0x283   :  { %657 = vmatpush1.msra.mxu1 %v448_v13  ;;  %790 = vmatpush1.msra.mxu0 %v759_v60  ;;  %v865_v13 = vld [vmem:[#allocation13 + $0x40] sm:$0xff]  ;;  %v1024_v60 = vld [vmem:[#allocation14 + $0x1a8] sm:$0xff] }
 0x284   :  { %658 = vmatprep.subr.mxu1 %v443_v14  ;;  %791 = vmatprep.subr.mxu0 %v758_v63  ;;  %v750_v14 = vld [vmem:[#allocation11 + $0x38] sm:$0xff]  ;;  %v1027_v58 = vld [vmem:[#allocation14 + $0x1c0] sm:$0xff]  ;;  %v1025_v63 = vld [vmem:[#allocation14 + $0x1b0] sm:$0xff] }
 0x285   :  { %659 = vmatpush1.msra.mxu1 %v442_v15  ;;  %792 = vmatpush1.msra.mxu0 %v757_v1  ;;  %v864_v15 = vld [vmem:[#allocation13 + $0x38] sm:$0xff] }
 0x286   :  { %660 = vmatprep.subr.mxu1 %v437_v16  ;;  %793 = vmatprep.subr.mxu0 %v756_v3  ;;  %v749_v16 = vld [vmem:[#allocation11 + $0x30] sm:$0xff]  ;;  %v1022_v1 = vld [vmem:[#allocation14 + $0x198] sm:$0xff] }
 0x287   :  { %661 = vmatpush1.msra.mxu1 %v436_v17  ;;  %794 = vmatpush1.msra.mxu0 %v755_v4  ;;  %v863_v17 = vld [vmem:[#allocation13 + $0x30] sm:$0xff]  ;;  %v1018_v4 = vld [vmem:[#allocation14 + $0x178] sm:$0xff] }
 0x288   :  { %662 = vmatprep.subr.mxu1 %v431_v18  ;;  %795 = vmatprep.subr.mxu0 %v754_v6  ;;  %v748_v18 = vld [vmem:[#allocation11 + $0x28] sm:$0xff]  ;;  %v1021_v3 = vld [vmem:[#allocation14 + $0x190] sm:$0xff] }
 0x289   :  { %663 = vmatpush1.msra.mxu1 %v430_v19  ;;  %796 = vmatpush1.msra.mxu0 %v753_v8  ;;  %v862_v19 = vld [vmem:[#allocation13 + $0x28] sm:$0xff]  ;;  %v1017_v6 = vld [vmem:[#allocation14 + $0x170] sm:$0xff]  ;;  %v1014_v8 = vld [vmem:[#allocation14 + $0x158] sm:$0xff] }
 0x28a   :  { %664 = vmatprep.subr.mxu1 %v425_v21  ;;  %797 = vmatprep.subr.mxu0 %v752_v10  ;;  %v747_v21 = vld [vmem:[#allocation11 + $0x20] sm:$0xff]  ;;  %v1013_v10 = vld [vmem:[#allocation14 + $0x150] sm:$0xff] }
 0x28b   :  { %665 = vmatpush1.msra.mxu1 %v424_v22  ;;  %798 = vmatpush1.msra.mxu0 %v751_v12  ;;  %v861_v22 = vld [vmem:[#allocation13 + $0x20] sm:$0xff]  ;;  %v1010_v12 = vld [vmem:[#allocation14 + $0x138] sm:$0xff] }
 0x28c   :  { %666 = vmatprep.subr.mxu1 %v419_v23  ;;  %799 = vmatprep.subr.mxu0 %v750_v14  ;;  %v746_v23 = vld [vmem:[#allocation11 + $0x18] sm:$0xff]  ;;  %v1009_v14 = vld [vmem:[#allocation14 + $0x130] sm:$0xff] }
 0x28d   :  { %667 = vmatpush1.msra.mxu1 %v418_v24  ;;  %800 = vmatpush1.msra.mxu0 %v749_v16  ;;  %v860_v24 = vld [vmem:[#allocation13 + $0x18] sm:$0xff] }
 0x28e   :  { %668 = vmatprep.subr.mxu1 %v413_v25  ;;  %801 = vmatprep.subr.mxu0 %v748_v18  ;;  %v745_v25 = vld [vmem:[#allocation11 + $0x10] sm:$0xff]  ;;  %v1006_v16 = vld [vmem:[#allocation14 + $0x118] sm:$0xff] }
 0x28f   :  { %669 = vmatpush1.msra.mxu1 %v412_v26  ;;  %802 = vmatpush1.msra.mxu0 %v747_v21  ;;  %v859_v26 = vld [vmem:[#allocation13 + $0x10] sm:$0xff]  ;;  %v1002_v21 = vld [vmem:[#allocation14 + $0xf8] sm:$0xff] }
 0x290   :  { %670 = vmatprep.subr.mxu1 %v407_v27  ;;  %803 = vmatprep.subr.mxu0 %v746_v23  ;;  %v744_v27 = vld [vmem:[#allocation11 + $0x8] sm:$0xff]  ;;  %v1005_v18 = vld [vmem:[#allocation14 + $0x110] sm:$0xff] }
 0x291   :  { %671 = vmatpush1.msra.mxu1 %v406_v28  ;;  %804 = vmatpush1.msra.mxu0 %v745_v25  ;;  %v858_v28 = vld [vmem:[#allocation13 + $0x8] sm:$0xff]  ;;  %v1001_v23 = vld [vmem:[#allocation14 + $0xf0] sm:$0xff]  ;;  %v998_v25 = vld [vmem:[#allocation14 + $0xd8] sm:$0xff] }
 0x292   :  { %705 = vmatmul.mubr.f32.vlgmr.msra.gmra.mxu1 %v1599_v61  ;;  %889 = vmatprep.subr.mxu1 %v888_v30  ;;  %v857_v30 = vld [vmem:[#allocation13] sm:$0xff] }
 0x293   :  { %953 = vmatprep.mubr.f32.mxu1 %v1508_v20  ;;  %890 = vmatpush1.msra.mxu1 %v887_v32 }
 0x294   :  { %891 = vmatprep.subr.mxu1 %v886_v34  ;;  %805 = vmatprep.subr.mxu0 %v744_v27  ;;  %v997_v27 = vld [vmem:[#allocation14 + $0xd0] sm:$0xff] }
 0x295   :  { %892 = vmatpush1.msra.mxu1 %v885_v36  ;;  %806 = vmatpush1.msra.mxu0 %v743_v29  ;;  %v994_v29 = vld [vmem:[#allocation14 + $0xb8] sm:$0xff] }
 0x296   :  { %893 = vmatprep.subr.mxu1 %v884_v38  ;;  %1035 = vmatprep.subr.mxu0 %v1032_v52  ;;  %v974_v52 = vld [vmem:[#allocation14 + $0x18] sm:$0xff] }
 0x297   :  { %894 = vmatpush1.msra.mxu1 %v883_v40 }
 0x298   :  { %895 = vmatprep.subr.mxu1 %v882_v42 }
 0x299   :  { %896 = vmatpush1.msra.mxu1 %v881_v44 }
 0x29a   :  { %897 = vmatprep.subr.mxu1 %v880_v47 }
 0x29b   :  { %898 = vmatpush1.msra.mxu1 %v879_v49 }
 0x29c   :  { %899 = vmatprep.subr.mxu1 %v878_v51 }
 0x29d   :  { %900 = vmatpush1.msra.mxu1 %v877_v53  ;;  %v1034_v53 = vld [vmem:[#allocation14 + $0x1f8] sm:$0xff] }
 0x29e   :  { %901 = vmatprep.subr.mxu1 %v876_v55  ;;  %v1033_v55 = vld [vmem:[#allocation14 + $0x1f0] sm:$0xff] }
 0x29f   :  { %902 = vmatpush1.msra.mxu1 %v875_v57  ;;  %v1030_v57 = vld [vmem:[#allocation14 + $0x1d8] sm:$0xff] }
 0x2a0   :  { %903 = vmatprep.subr.mxu1 %v874_v59  ;;  %v1029_v59 = vld [vmem:[#allocation14 + $0x1d0] sm:$0xff] }
 0x2a1   :  { %904 = vmatpush1.msra.mxu1 %v873_v62  ;;  %v1026_v62 = vld [vmem:[#allocation14 + $0x1b8] sm:$0xff] }
 0x2a2   :  { %905 = vmatprep.subr.mxu1 %v872_v0  ;;  %v1020_v0 = vld [vmem:[#allocation14 + $0x188] sm:$0xff] }
 0x2a3   :  { %906 = vmatpush1.msra.mxu1 %v871_v2  ;;  %v1019_v2 = vld [vmem:[#allocation14 + $0x180] sm:$0xff] }
 0x2a4   :  { %907 = vmatprep.subr.mxu1 %v870_v45  ;;  %v1016_v45 = vld [vmem:[#allocation14 + $0x168] sm:$0xff] }
 0x2a5   :  { %908 = vmatpush1.msra.mxu1 %v869_v5  ;;  %v1015_v5 = vld [vmem:[#allocation14 + $0x160] sm:$0xff] }
 0x2a6   :  { %909 = vmatprep.subr.mxu1 %v868_v7  ;;  %v1012_v7 = vld [vmem:[#allocation14 + $0x148] sm:$0xff] }
 0x2a7   :  { %910 = vmatpush1.msra.mxu1 %v867_v9  ;;  %v1011_v9 = vld [vmem:[#allocation14 + $0x140] sm:$0xff] }
 0x2a8   :  { %911 = vmatprep.subr.mxu1 %v866_v11  ;;  %v1008_v11 = vld [vmem:[#allocation14 + $0x128] sm:$0xff] }
 0x2a9   :  { %912 = vmatpush1.msra.mxu1 %v865_v13  ;;  %v1007_v13 = vld [vmem:[#allocation14 + $0x120] sm:$0xff] }
 0x2aa   :  { %913 = vmatprep.subr.mxu1 %v864_v15  ;;  %v1004_v15 = vld [vmem:[#allocation14 + $0x108] sm:$0xff] }
 0x2ab   :  { %914 = vmatpush1.msra.mxu1 %v863_v17  ;;  %v1003_v17 = vld [vmem:[#allocation14 + $0x100] sm:$0xff] }
 0x2ac   :  { %915 = vmatprep.subr.mxu1 %v862_v19  ;;  %v1000_v19 = vld [vmem:[#allocation14 + $0xe8] sm:$0xff] }
 0x2ad   :  { %916 = vmatpush1.msra.mxu1 %v861_v22  ;;  %v999_v22 = vld [vmem:[#allocation14 + $0xe0] sm:$0xff] }
 0x2ae   :  { %917 = vmatprep.subr.mxu1 %v860_v24  ;;  %v996_v24 = vld [vmem:[#allocation14 + $0xc8] sm:$0xff] }
 0x2af   :  { %918 = vmatpush1.msra.mxu1 %v859_v26  ;;  %v995_v26 = vld [vmem:[#allocation14 + $0xc0] sm:$0xff] }
 0x2b0   :  { %919 = vmatprep.subr.mxu1 %v858_v28  ;;  %v992_v28 = vld [vmem:[#allocation14 + $0xa8] sm:$0xff] }
 0x2b1   :  { %920 = vmatpush1.msra.mxu1 %v857_v30  ;;  %v991_v30 = vld [vmem:[#allocation14 + $0xa0] sm:$0xff] }
 0x2b2   :  { %1106 = vmatprep.subr.mxu1 %v1034_v53  ;;  %v971_v53 = vld [vmem:[#allocation14] sm:$0xff] }
 0x332   :  { %v564_v31 = vpop.f32.mrf.mxu1  ;;  %v635_v32 = vpop.f32.mrf.mxu0 }
 0x333   :  { %v1228_v33 = vmul.f32 -1.442695, %v564_v31  ;;  %v1229_v34 = vmul.f32 -1.442695, %v635_v32  ;;  %v993_v31 = vld [vmem:[#allocation14 + $0xb0] sm:$0xff]  ;;  %v988_v32 = vld [vmem:[#allocation14 + $0x88] sm:$0xff] }
 0x334   :  { %v566_v39 = vpop.f32.mrf.mxu1  ;;  %v637_v40 = vpop.f32.mrf.mxu0 }
 0x335   :  { %1266 = vpow2.f32 %v1228_v33  ;;  %v717_v41 = vmax.f32 %v566_v39, 0.0  ;;  %v728_v42 = vmax.f32 %v637_v40, 0.0  ;;  %v990_v33 = vld [vmem:[#allocation14 + $0x98] sm:$0xff]  ;;  %v985_v39 = vld [vmem:[#allocation14 + $0x70] sm:$0xff]  ;;  %v980_v40 = vld [vmem:[#allocation14 + $0x48] sm:$0xff] }
 0x336   :  { %1268 = vpow2.f32 %v1229_v34  ;;  %v987_v34 = vld [vmem:[#allocation14 + $0x80] sm:$0xff] }
 0x337   :  { %v718_v43 = vsub.f32 %v717_v41, %v1599_v61  ;;  %v729_v46 = vsub.f32 %v728_v42, %v1599_v61  ;;  %v982_v41 = vld [vmem:[#allocation14 + $0x58] sm:$0xff]  ;;  %v979_v42 = vld [vmem:[#allocation14 + $0x40] sm:$0xff] }
 0x342   :  { %v1267_v35 = vpop.eup %1266 }
 0x343   :  { %v1269_v36 = vpop.eup %1268  ;;  %v714_v37 = vadd.f32 1.0, %v1267_v35  ;;  %v989_v35 = vld [vmem:[#allocation14 + $0x90] sm:$0xff] }
 0x344   :  { %v725_v38 = vadd.f32 1.0, %v1269_v36  ;;  %v984_v36 = vld [vmem:[#allocation14 + $0x68] sm:$0xff] }
 0x345   :  { %1270 = vrcp.f32 %v714_v37  ;;  %v986_v37 = vld [vmem:[#allocation14 + $0x78] sm:$0xff] }
 0x346   :  { %1272 = vrcp.f32 %v725_v38  ;;  %v983_v38 = vld [vmem:[#allocation14 + $0x60] sm:$0xff] }
 0x352   :  { %v1271_v44 = vpop.eup %1270 }
 0x353   :  { %v1273_v47 = vpop.eup %1272  ;;  %v719_v48 = vmul.f32 %v1271_v44, %v718_v43  ;;  %v981_v43 = vld [vmem:[#allocation14 + $0x50] sm:$0xff]  ;;  %v976_v44 = vld [vmem:[#allocation14 + $0x28] sm:$0xff] }
 0x354   :  { %v730_v49 = vmul.f32 %v1273_v47, %v729_v46  ;;  %v978_v46 = vld [vmem:[#allocation14 + $0x38] sm:$0xff]  ;;  %v975_v47 = vld [vmem:[#allocation14 + $0x20] sm:$0xff] }
 0x355   :  { %v1610_v50 = vadd.f32 %v719_v48, %v1599_v61  ;;  %v977_v48 = vld [vmem:[#allocation14 + $0x30] sm:$0xff] }
 0x356   :  { %v1613_v51 = vadd.f32 %v730_v49, %v1599_v61  ;;  %v972_v49 = vld [vmem:[#allocation14 + $0x8] sm:$0xff] }
 0x357   :  { %840 = vmatmul.mubr.f32.vlgmr.msra.gmra.mxu0 %v1610_v50 }
 0x358   :  { %954 = vmatmul.mubr.f32.vlgmr.msra.gmra.mxu1 %v1613_v51  ;;  %1099 = vmatprep.mubr.f32.mxu0 %v1508_v20 }
 0x359   :  { %1170 = vmatprep.mubr.f32.mxu1 %v1508_v20  ;;  %1036 = vmatpush1.msra.mxu0 %v1031_v54  ;;  %v1023_v20 = vld [vmem:[#allocation14 + $0x1a0] sm:$0xff]  ;;  %v973_v54 = vld [vmem:[#allocation14 + $0x10] sm:$0xff] }
 0x35a   :  { %1107 = vmatpush1.msra.mxu1 %v1033_v55  ;;  %1037 = vmatprep.subr.mxu0 %v1028_v56 }
 0x35b   :  { %1108 = vmatprep.subr.mxu1 %v1030_v57  ;;  %1038 = vmatpush1.msra.mxu0 %v1027_v58 }
 0x35c   :  { %1109 = vmatpush1.msra.mxu1 %v1029_v59  ;;  %1039 = vmatprep.subr.mxu0 %v1024_v60 }
 0x35d   :  { %1110 = vmatprep.subr.mxu1 %v1026_v62  ;;  %1040 = vmatpush1.msra.mxu0 %v1023_v20 }
 0x35e   :  { %1111 = vmatpush1.msra.mxu1 %v1025_v63  ;;  %1041 = vmatprep.subr.mxu0 %v1020_v0 }
 0x35f   :  { %1112 = vmatprep.subr.mxu1 %v1022_v1  ;;  %1042 = vmatpush1.msra.mxu0 %v1019_v2  ;;  %v706_v1 = vpop.f32.mrf.mxu1 }
 0x360   :  { %1113 = vmatpush1.msra.mxu1 %v1021_v3  ;;  %1043 = vmatprep.subr.mxu0 %v1016_v45  ;;  %v1230_v2 = vmul.f32 -1.442695, %v706_v1 }
 0x361   :  { %1114 = vmatprep.subr.mxu1 %v1018_v4  ;;  %1044 = vmatpush1.msra.mxu0 %v1015_v5  ;;  %v708_v3 = vpop.f32.mrf.mxu1 }
 0x362   :  { %1115 = vmatpush1.msra.mxu1 %v1017_v6  ;;  %1045 = vmatprep.subr.mxu0 %v1012_v7 }
 0x363   :  { %1116 = vmatprep.subr.mxu1 %v1014_v8  ;;  %1046 = vmatpush1.msra.mxu0 %v1011_v9 }
 0x364   :  { %1117 = vmatpush1.msra.mxu1 %v1013_v10  ;;  %1047 = vmatprep.subr.mxu0 %v1008_v11 }
 0x365   :  { %1118 = vmatprep.subr.mxu1 %v1010_v12  ;;  %1048 = vmatpush1.msra.mxu0 %v1007_v13 }
 0x366   :  { %1119 = vmatpush1.msra.mxu1 %v1009_v14  ;;  %1049 = vmatprep.subr.mxu0 %v1004_v15 }
 0x367   :  { %1120 = vmatprep.subr.mxu1 %v1006_v16  ;;  %1050 = vmatpush1.msra.mxu0 %v1003_v17 }
 0x368   :  { %1121 = vmatpush1.msra.mxu1 %v1005_v18  ;;  %1051 = vmatprep.subr.mxu0 %v1000_v19 }
 0x369   :  { %1122 = vmatprep.subr.mxu1 %v1002_v21  ;;  %1052 = vmatpush1.msra.mxu0 %v999_v22 }
 0x36a   :  { %1123 = vmatpush1.msra.mxu1 %v1001_v23  ;;  %1053 = vmatprep.subr.mxu0 %v996_v24  ;;  %v739_v24 = vsub.f32 %v708_v3, %v1599_v61 }
 0x36b   :  { %1124 = vmatprep.subr.mxu1 %v998_v25  ;;  %1054 = vmatpush1.msra.mxu0 %v995_v26  ;;  %v721_v26 = vadd.f32 %v1610_v50, %v1599_v61 }
 0x36c   :  { %1125 = vmatpush1.msra.mxu1 %v997_v27  ;;  %1055 = vmatprep.subr.mxu0 %v992_v28 }
 0x36d   :  { %1126 = vmatprep.subr.mxu1 %v994_v29  ;;  %1056 = vmatpush1.msra.mxu0 %v991_v30 }
 0x36e   :  { %1127 = vmatpush1.msra.mxu1 %v993_v31  ;;  %1057 = vmatprep.subr.mxu0 %v988_v32  ;;  %v732_v31 = vadd.f32 %v1613_v51, %v721_v26 }
 0x36f   :  { %1128 = vmatprep.subr.mxu1 %v990_v33  ;;  %1058 = vmatpush1.msra.mxu0 %v987_v34 }
 0x370   :  { %1129 = vmatpush1.msra.mxu1 %v989_v35  ;;  %1059 = vmatprep.subr.mxu0 %v984_v36 }
 0x371   :  { %1130 = vmatprep.subr.mxu1 %v986_v37  ;;  %1060 = vmatpush1.msra.mxu0 %v983_v38 }
 0x372   :  { %1131 = vmatpush1.msra.mxu1 %v985_v39  ;;  %1061 = vmatprep.subr.mxu0 %v980_v40 }
 0x373   :  { %1132 = vmatprep.subr.mxu1 %v982_v41  ;;  %1062 = vmatpush1.msra.mxu0 %v979_v42 }
 0x374   :  { %1133 = vmatpush1.msra.mxu1 %v981_v43  ;;  %1063 = vmatprep.subr.mxu0 %v976_v44 }
 0x375   :  { %1134 = vmatprep.subr.mxu1 %v978_v46  ;;  %1064 = vmatpush1.msra.mxu0 %v975_v47 }
 0x376   :  { %1135 = vmatpush1.msra.mxu1 %v977_v48  ;;  %1065 = vmatprep.subr.mxu0 %v972_v49 }
 0x377   :  { %1136 = vmatprep.subr.mxu1 %v974_v52  ;;  %1066 = vmatpush1.msra.mxu0 %v971_v53 }
 0x378   :  { %1137 = vmatpush1.msra.mxu1 %v973_v54 }
 0x417   :  { %v841_v55 = vpop.f32.mrf.mxu0 }
 0x418   :  { %v1231_v56 = vmul.f32 -1.442695, %v841_v55  ;;  %v955_v45 = vpop.f32.mrf.mxu1 }
 0x419   :  { %v843_v57 = vpop.f32.mrf.mxu0  ;;  %v1232_v4 = vmul.f32 -1.442695, %v955_v45 }
 0x41a   :  { %1274 = vpow2.f32 %v1231_v56  ;;  %v957_v5 = vpop.f32.mrf.mxu1 }
 0x41b   :  { %1276 = vtanh.f32 %v843_v57 }
 0x427   :  { %v1275_v58 = vpop.eup %1274 }
 0x428   :  { %v849_v59 = vadd.f32 1.0, %v1275_v58  ;;  %v1277_v60 = vpop.eup %1276 }
 0x429   :  { %v853_v62 = vsub.f32 %v1277_v60, %v1610_v50 }
 0x42a   :  { %1278 = vrcp.f32 %v849_v59 }
 0x42b   :  { %1280 = vpow2.f32 %v1230_v2 }
 0x42c   :  { %1282 = vpow2.f32 %v1232_v4 }
 0x437   :  { %v1279_v20 = vpop.eup %1278 }
 0x438   :  { %v854_v63 = vmul.f32 %v1279_v20, %v853_v62  ;;  %v1281_v10 = vpop.eup %1280 }
 0x439   :  { %v736_v13 = vadd.f32 1.0, %v1281_v10  ;;  %v1283_v14 = vpop.eup %1282 }
 0x43a   :  { %v855_v0 = vadd.f32 %v854_v63, %v1610_v50  ;;  %v963_v15 = vadd.f32 1.0, %v1283_v14 }
 0x43c   :  { %1100 = vmatmul.mubr.f32.vlgmr.msra.gmra.mxu0 %v855_v0  ;;  %1171 = vmatmul.mubr.f32.vlgmr.msra.gmra.mxu1 %v855_v0 }
 0x4fc   :  { %v1101_v6 = vpop.f32.mrf.mxu0  ;;  %v1172_v7 = vpop.f32.mrf.mxu1 }
 0x4fd   :  { %v1233_v8 = vmul.f32 -1.442695, %v1101_v6  ;;  %v1235_v9 = vmul.f32 -1.442695, %v1172_v7 }
 0x4fe   :  { %v1103_v11 = vpop.f32.mrf.mxu0  ;;  %v1174_v28 = vpop.f32.mrf.mxu1 }
 0x4ff   :  { %1284 = vpow2.f32 %v1233_v8  ;;  %v1234_v12 = vmul.f32 -1.442695, %v1103_v11  ;;  %v1199_v32 = vmax.f32 %v1174_v28, 0.0 }
 0x500   :  { %1286 = vpow2.f32 %v1235_v9 }
 0x501   :  { %1288 = vpow2.f32 %v1234_v12  ;;  %v1200_v38 = vsub.f32 %v1199_v32, %v855_v0 }
 0x502   :  { %1290 = vrcp.f32 %v736_v13 }
 0x503   :  { %1292 = vtanh.f32 %v957_v5 }
 0x504   :  { %1294 = vrcp.f32 %v963_v15 }
 0x50c   :  { %v1285_v16 = vpop.eup %1284 }
 0x50d   :  { %v1287_v17 = vpop.eup %1286  ;;  %v1180_v21 = vadd.f32 1.0, %v1285_v16 }
 0x50e   :  { %v1289_v18 = vpop.eup %1288  ;;  %v1196_v19 = vadd.f32 1.0, %v1287_v17 }
 0x50f   :  { %v1186_v22 = vadd.f32 1.0, %v1289_v18  ;;  %v1291_v23 = vpop.eup %1290 }
 0x510   :  { %1296 = vrcp.f32 %v1196_v19  ;;  %v740_v25 = vmul.f32 %v1291_v23, %v739_v24  ;;  %v1293_v27 = vpop.eup %1292 }
 0x511   :  { %1298 = vrcp.f32 %v1186_v22  ;;  %v1295_v30 = vpop.eup %1294  ;;  %v967_v33 = vsub.f32 %v1293_v27, %v1613_v51 }
 0x512   :  { %1300 = vrcp.f32 %v1180_v21  ;;  %v741_v29 = vadd.f32 %v740_v25, %v1599_v61 }
 0x513   :  { %v968_v36 = vmul.f32 %v1295_v30, %v967_v33 }
 0x514   :  { %v742_v35 = vadd.f32 %v741_v29, %v732_v31 }
 0x515   :  { %v969_v50 = vadd.f32 %v968_v36, %v1613_v51 }
 0x516   :  { %v856_v39 = vadd.f32 %v855_v0, %v742_v35 }
 0x518   :  { %v970_v44 = vadd.f32 %v969_v50, %v856_v39 }
 0x51d   :  { %v1297_v34 = vpop.eup %1296 }
 0x51e   :  { %v1299_v37 = vpop.eup %1298  ;;  %v1201_v42 = vmul.f32 %v1297_v34, %v1200_v38 }
 0x51f   :  { %v1189_v40 = vsub.f32 %v1299_v37, %v855_v0  ;;  %v1301_v41 = vpop.eup %1300 }
 0x520   :  { %v1202_v46 = vadd.f32 %v1201_v42, %v855_v0 }
 0x521   :  { %v1190_v43 = vmul.f32 %v1301_v41, %v1189_v40 }
 0x523   :  { %v1191_v61 = vadd.f32 %v1190_v43, %v855_v0 }
 0x525   :  { %v1192_v47 = vadd.f32 %v1191_v61, %v970_v44 }
 0x527   :  { %v1203_v48 = vadd.f32 %v1202_v46, %v1192_v47 }
 0x529   :  { %v1204_v49 = vmul.f32 0.125, %v1203_v48 }
 0x52b   :  { %1205 = vst [vmem:[#allocation16] sm:$0xff] %v1204_v49 }
 0x52c   :  { %1473 = shalt.err (!%p1470_p2)
}
 0x52d   :  { %1215 = dma.vmem_to_hbm [thread:$0]  %s1213_s7, 128, %s1639_s8, [#allocation4]  }
 0x52e   :  { %1492 = dma.done.wait [#allocation4], 128  }
 0x52f   :  { %1493 = vsyncadd [#allocation4], 4294967168 }
 0x530   :  { %1219 = vsyncpa [#allocation3], 1 }
 0x531   :  { %1220 = vsyncpa [#allocation6], 1 }
 0x532   :  { %1221 = vsyncpa [#allocation9], 1 }
 0x533   :  { %1222 = vsyncpa [#allocation12], 1 }
 0x534   :  { %1223 = vsyncpa [#allocation15], 1 }
 0x535   :  { %1224 = vsyncpa [#allocation4], 1 }

</bundles_post_ra>
